<compile_context>
chip_gen: v5e
topology: v5e:2x2
jax: 0.10.0
libtpu: 0.0.40
codegen_flags: <defaults>
</compile_context>

<pallas_src>
import functools
import math

import jax
import jax.numpy as jnp
import numpy as np
from jax import lax
from jax.experimental import pallas as pl
from jax.experimental.pallas import tpu as pltpu

LN_EPS = 1e-5


# ----------------------------------------------------------------------------- kernel
def _layernorm(x, gamma, beta):
    mean = jnp.mean(x, axis=-1, keepdims=True)
    var = jnp.mean((x - mean) ** 2, axis=-1, keepdims=True)
    return (x - mean) * lax.rsqrt(var + LN_EPS) * gamma + beta


def speechformer_layer_kernel(x_ref, ing_ref, inb_ref,
                              wqkvT_ref, bqkvT_ref, wo_ref, bo_ref,
                              ln1g_ref, ln1b_ref, w1_ref, b1_ref,
                              w2_ref, b2_ref, ln2g_ref, ln2b_ref,
                              o_ref, act_ref,
                              *, num_layers, num_heads, head_dim, matmul_dtype):
    l = pl.program_id(1)
    D = num_heads * head_dim
    md = matmul_dtype

    def mm(a, b):
        # MXU matmul; bf16 operand feeding (f32 accumulation) in production mode.
        return jnp.dot(a.astype(md), b.astype(md),
                       preferred_element_type=jnp.float32)

    # First layer step: block-level input LayerNorm seeds the carried activation.
    @pl.when(l == 0)
    def _():
        act_ref[...] = _layernorm(x_ref[0], ing_ref[...], inb_ref[...])

    out = act_ref[...]                                  # (T, D) f32, resident in VMEM
    T = out.shape[0]

    # --- Speech_MSA_v2, global-attention path -----------------------------------
    # QKV produced already transposed: (3D, T) = wqkvT (3D, D) contracted with out
    # over the embed dim.  No separate q/k/v (T, D) transposes needed.
    qkvT = lax.dot_general(wqkvT_ref[0].astype(md), out.astype(md),
                           dimension_numbers=(((1,), (1,)), ((), ())),
                           preferred_element_type=jnp.float32)
    qkvT = qkvT + bqkvT_ref[0]                          # (3D, T) + (3D, 1)

    # Leading-dim splits are free (no lane/sublane reshuffle).  The 1/sqrt(hd)
    # query scaling is already folded into rows [:D] of wqkvT / bqkvT.
    qT = qkvT[:D].reshape(num_heads, head_dim, T)       # (H, hd, T)
    kT = qkvT[D:2 * D].reshape(num_heads, head_dim, T)  # (H, hd, T)
    vT = qkvT[2 * D:].reshape(num_heads, head_dim, T)   # (H, hd, T)

    s = jnp.einsum("hdq,hdk->hqk", qT.astype(md), kT.astype(md),
                   preferred_element_type=jnp.float32)  # (H, Tq, Tk)
    s = s - jnp.max(s, axis=-1, keepdims=True)
    p = jnp.exp(s)
    p = p * pl.reciprocal(jnp.sum(p, axis=-1, keepdims=True), approx=True)

    ctx = jnp.einsum("hqk,hdk->hdq", p.astype(md), vT.astype(md),
                     preferred_element_type=jnp.float32)  # (H, hd, Tq)
    attn = ctx.reshape(D, T).T                          # single XLU transpose / layer
    attn = mm(attn, wo_ref[0]) + bo_ref[0]

    # residual + LayerNorm
    x1 = _layernorm(out + attn, ln1g_ref[0], ln1b_ref[0])

    # --- feed-forward ------------------------------------------------------------
    h1 = jnp.maximum(mm(x1, w1_ref[0]) + b1_ref[0], 0.0)   # relu
    h2 = mm(h1, w2_ref[0]) + b2_ref[0]
    new_out = _layernorm(x1 + h2, ln2g_ref[0], ln2b_ref[0])

    act_ref[...] = new_out                              # carry to next layer step

    @pl.when(l == num_layers - 1)
    def _():
        o_ref[0] = new_out.astype(o_ref.dtype)


# ----------------------------------------------------------------------------- wrapper
def _stack_layer_params(layers, num_heads, matmul_dtype):
    """Stack per-layer params along a leading layer axis; fold Q scaling; cast
    matmul weights (not biases / LN params) to the MXU feed dtype."""
    D = layers[0]["wqkv"].shape[0]
    scale = (D // num_heads) ** -0.5
    wdt = matmul_dtype

    def stack(fn):
        return jnp.stack([fn(lp) for lp in layers], axis=0)

    return [
        stack(lambda lp: lp["wqkv"].T.at[:D].multiply(scale).astype(wdt)),  # (L,3D,D)
        stack(lambda lp: lp["bqkv"].reshape(-1, 1).at[:D].multiply(scale)),  # (L,3D,1)
        stack(lambda lp: lp["wo"].astype(wdt)),                              # (L,D,D)
        stack(lambda lp: lp["bo"]),                                          # (L,1,D)
        stack(lambda lp: lp["ln1g"]),
        stack(lambda lp: lp["ln1b"]),
        stack(lambda lp: lp["w1"].astype(wdt)),                              # (L,D,F)
        stack(lambda lp: lp["b1"]),                                          # (L,1,F)
        stack(lambda lp: lp["w2"].astype(wdt)),                              # (L,F,D)
        stack(lambda lp: lp["b2"]),                                          # (L,1,D)
        stack(lambda lp: lp["ln2g"]),
        stack(lambda lp: lp["ln2b"]),
    ]


def _vmem_budget(T, D, F, H, w_itemsize):
    """Estimate the per-step VMEM footprint and clamp to a v7x-safe budget."""
    f32 = 4
    per_layer_w = (3 * D * D + D * D + D * F + F * D) * w_itemsize \
        + (3 * D + 7 * D + F) * f32                      # biases + LN params
    weights = 2 * per_layer_w                            # double-buffered over layers
    act = T * D * f32                                    # carried activation scratch
    io = 2 * 2 * T * D * f32                             # x + out blocks, 2 buffers
    attn = (3 * D * T + 2 * H * T * T + D * T) * f32     # qkvT + scores/probs + ctx
    ffn = 2 * T * F * f32
    need = weights + act + io + attn + ffn + (2 << 20)
    return int(min(max(need * 3 // 2, 16 << 20), 56 << 20))


def speechformer_v2_blocks(x, params, num_heads, *, matmul_dtype=jnp.bfloat16,
                           local_size=0, num_wtok=0, kmeans_mask=None):
    """Fused input-LayerNorm + all encoder layers in one pallas_call.

    grid = (batch, layer); layer axis is the serial ("arbitrary") axis with the
    activation carried in VMEM scratch; only one layer's weights are resident.
    """
    if local_size != 0 or num_wtok != 0 or kmeans_mask is not None:
        raise NotImplementedError(
            "Only the global-attention path of Speech_MSA_v2 is implemented "
            "(local_size=0, num_wtok=0, kmeans_mask=None).")

    B, T, D = x.shape
    layers = params["layers"]
    num_layers = len(layers)
    head_dim = D // num_heads
    F = layers[0]["w1"].shape[1]

    stacked = _stack_layer_params(layers, num_heads, matmul_dtype)

    kernel = functools.partial(
        speechformer_layer_kernel,
        num_layers=num_layers, num_heads=num_heads, head_dim=head_dim,
        matmul_dtype=matmul_dtype)

    def layer_spec(arr):
        nrest = arr.ndim - 1
        return pl.BlockSpec((1,) + arr.shape[1:],
                            lambda b, l, _n=nrest: (l,) + (0,) * _n)

    def const_spec(arr):
        nd = arr.ndim
        return pl.BlockSpec(arr.shape, lambda b, l, _nd=nd: (0,) * _nd)

    in_specs = [pl.BlockSpec((1, T, D), lambda b, l: (b, 0, 0)),
                const_spec(params["in_g"]), const_spec(params["in_b"])]
    in_specs += [layer_spec(w) for w in stacked]

    vmem_bytes = _vmem_budget(T, D, F, num_heads,
                              jnp.dtype(matmul_dtype).itemsize)

    return pl.pallas_call(
        kernel,
        out_shape=jax.ShapeDtypeStruct((B, T, D), x.dtype),
        grid_spec=pltpu.PrefetchScalarGridSpec(
            num_scalar_prefetch=0,
            grid=(B, num_layers),
            in_specs=in_specs,
            out_specs=pl.BlockSpec((1, T, D), lambda b, l: (b, 0, 0)),
            scratch_shapes=[pltpu.VMEM((T, D), jnp.float32)]),
        compiler_params=pltpu.CompilerParams(
            dimension_semantics=("parallel", "arbitrary"),
            vmem_limit_bytes=vmem_bytes),
    )(x, params["in_g"], params["in_b"], *stacked)


# ----------------------------------------------------------------------------- params
def _xavier_uniform(key, out_dim, in_dim):
    # matches nn.init.xavier_uniform_ on a torch (out, in) weight; returned as (in, out)
    limit = math.sqrt(6.0 / (in_dim + out_dim))
    w = jax.random.uniform(key, (out_dim, in_dim), jnp.float32, -limit, limit)
    return w.T


def _linear_bias(key, out_dim, in_dim):
    bound = 1.0 / math.sqrt(in_dim)
    return jax.random.uniform(key, (1, out_dim), jnp.float32, -bound, bound)


def init_params(key, num_layers, embed_dim, ffn_embed_dim, num_heads):
    D, F = embed_dim, ffn_embed_dim
    params = {
        "in_g": jnp.ones((1, D), jnp.float32),
        "in_b": jnp.zeros((1, D), jnp.float32),
        "layers": [],
    }
    for _ in range(num_layers):
        key, *ks = jax.random.split(key, 9)
        params["layers"].append({
            "wqkv": _xavier_uniform(ks[0], 3 * D, D),
            "bqkv": _linear_bias(ks[1], 3 * D, D),
            "wo":   _xavier_uniform(ks[2], D, D),
            "bo":   _linear_bias(ks[3], D, D),
            "ln1g": jnp.ones((1, D), jnp.float32),
            "ln1b": jnp.zeros((1, D), jnp.float32),
            "w1":   _xavier_uniform(ks[4], F, D),
            "b1":   _linear_bias(ks[5], F, D),
            "w2":   _xavier_uniform(ks[6], D, F),
            "b2":   _linear_bias(ks[7], D, F),
            "ln2g": jnp.ones((1, D), jnp.float32),
            "ln2b": jnp.zeros((1, D), jnp.float32),
        })
    return params


# ----------------------------------------------------------------------------- pure-JAX reference
def reference_forward(x, blocks_params, num_heads):
    def ln(v, g, b):
        m = jnp.mean(v, axis=-1, keepdims=True)
        var = jnp.mean((v - m) ** 2, axis=-1, keepdims=True)
        return (v - m) * lax.rsqrt(var + LN_EPS) * g + b

    with jax.default_matmul_precision("highest"):
        out = ln(x, blocks_params["in_g"], blocks_params["in_b"])
        B, T, D = x.shape
        hd = D // num_heads
        for p in blocks_params["layers"]:
            qkv = out @ p["wqkv"] + p["bqkv"]
            q, k, v = qkv[..., :D] * hd ** -0.5, qkv[..., D:2 * D], qkv[..., 2 * D:]
            q = q.reshape(B, T, num_heads, hd).transpose(0, 2, 1, 3)
            k = k.reshape(B, T, num_heads, hd).transpose(0, 2, 1, 3)
            v = v.reshape(B, T, num_heads, hd).transpose(0, 2, 1, 3)
            s = jnp.einsum("bhqd,bhkd->bhqk", q, k)
            a = jax.nn.softmax(s, axis=-1)
            o = jnp.einsum("bhqk,bhkd->bhqd", a, v).transpose(0, 2, 1, 3).reshape(B, T, D)
            o = o @ p["wo"] + p["bo"]
            out = ln(out + o, p["ln1g"], p["ln1b"])
            f = jnp.maximum(out @ p["w1"] + p["b1"], 0.0) @ p["w2"] + p["b2"]
            out = ln(out + f, p["ln2g"], p["ln2b"])
        return out


# ----------------------------------------------------------------------------- main
if __name__ == "__main__":
    num_layers = 2
    embed_dim = 64
    ffn_embed_dim = 128
    num_heads = 8
    B, T = 2, 8

    key = jax.random.PRNGKey(0)
    kx, kp = jax.random.split(key)
    x = jax.random.normal(kx, (B, T, embed_dim), jnp.float32)
    params = init_params(kp, num_layers, embed_dim, ffn_embed_dim, num_heads)

    ref = jax.block_until_ready(reference_forward(x, params, num_heads))

    # f32-operand MXU path: tight check against the f32 reference.
    out_f32 = jax.block_until_ready(
        speechformer_v2_blocks(x, params, num_heads, matmul_dtype=jnp.float32))
    np.testing.assert_allclose(np.asarray(out_f32), np.asarray(ref),
                               rtol=1e-2, atol=1e-2)

    # bf16-operand / f32-accumulate MXU path (production default): loose check.
    out_bf16 = jax.block_until_ready(
        speechformer_v2_blocks(x, params, num_heads))
    np.testing.assert_allclose(np.asarray(out_bf16), np.asarray(ref),
                               rtol=1e-1, atol=1e-1)

    print("KERNEL_OK")
</pallas_src>

<mosaic_0001>
module attributes {stable_mosaic.version = 11 : i64} {
  func.func @speechformer_layer_kernel(%arg0: i32, %arg1: i32, %arg2: memref<1x8x64xf32, #tpu.memory_space<vmem>>, %arg3: memref<1x64xf32, #tpu.memory_space<vmem>>, %arg4: memref<1x64xf32, #tpu.memory_space<vmem>>, %arg5: memref<1x192x64xf32, #tpu.memory_space<vmem>>, %arg6: memref<1x192x1xf32, #tpu.memory_space<vmem>>, %arg7: memref<1x64x64xf32, #tpu.memory_space<vmem>>, %arg8: memref<1x1x64xf32, #tpu.memory_space<vmem>>, %arg9: memref<1x1x64xf32, #tpu.memory_space<vmem>>, %arg10: memref<1x1x64xf32, #tpu.memory_space<vmem>>, %arg11: memref<1x64x128xf32, #tpu.memory_space<vmem>>, %arg12: memref<1x1x128xf32, #tpu.memory_space<vmem>>, %arg13: memref<1x128x64xf32, #tpu.memory_space<vmem>>, %arg14: memref<1x1x64xf32, #tpu.memory_space<vmem>>, %arg15: memref<1x1x64xf32, #tpu.memory_space<vmem>>, %arg16: memref<1x1x64xf32, #tpu.memory_space<vmem>>, %arg17: memref<1x8x64xf32, #tpu.memory_space<vmem>>, %arg18: memref<8x64xf32, #tpu.memory_space<vmem>>) attributes {dimension_semantics = [#tpu.dimension_semantics<parallel>, #tpu.dimension_semantics<arbitrary>], iteration_bounds = array<i64: 2, 2>, scalar_prefetch = 0 : i64, scratch_operands = 1 : i64, tpu.core_type = #tpu.core_type<tc>, window_params = [{transform_indices = @transform_0, window_bounds = array<i64: 1, 8, 64>}, {pipeline_mode = #tpu.pipeline_mode<synchronous>, transform_indices = @transform_1, window_bounds = array<i64: 1, 64>}, {pipeline_mode = #tpu.pipeline_mode<synchronous>, transform_indices = @transform_2, window_bounds = array<i64: 1, 64>}, {transform_indices = @transform_3, window_bounds = array<i64: 1, 192, 64>}, {transform_indices = @transform_4, window_bounds = array<i64: 1, 192, 1>}, {transform_indices = @transform_5, window_bounds = array<i64: 1, 64, 64>}, {transform_indices = @transform_6, window_bounds = array<i64: 1, 1, 64>}, {transform_indices = @transform_7, window_bounds = array<i64: 1, 1, 64>}, {transform_indices = @transform_8, window_bounds = array<i64: 1, 1, 64>}, {transform_indices = @transform_9, window_bounds = array<i64: 1, 64, 128>}, {transform_indices = @transform_10, window_bounds = array<i64: 1, 1, 128>}, {transform_indices = @transform_11, window_bounds = array<i64: 1, 128, 64>}, {transform_indices = @transform_12, window_bounds = array<i64: 1, 1, 64>}, {transform_indices = @transform_13, window_bounds = array<i64: 1, 1, 64>}, {transform_indices = @transform_14, window_bounds = array<i64: 1, 1, 64>}, {transform_indices = @transform_15, window_bounds = array<i64: 1, 8, 64>}]} {
    %c0_i32 = arith.constant 0 : i32
    %0 = arith.cmpi eq, %arg1, %c0_i32 : i32
    %1 = arith.extui %0 : i1 to i32
    %c0_i32_0 = arith.constant 0 : i32
    %2 = arith.cmpi ne, %1, %c0_i32_0 : i32
    scf.if %2 {
      %c0_59 = arith.constant 0 : index
      %c0_60 = arith.constant 0 : index
      %c0_61 = arith.constant 0 : index
      %112 = vector.load %arg2[%c0_59, %c0_60, %c0_61] : memref<1x8x64xf32, #tpu.memory_space<vmem>>, vector<1x8x64xf32>
      %113 = vector.shape_cast %112 : vector<1x8x64xf32> to vector<8x64xf32>
      %c0_62 = arith.constant 0 : index
      %c0_63 = arith.constant 0 : index
      %114 = vector.load %arg3[%c0_62, %c0_63] : memref<1x64xf32, #tpu.memory_space<vmem>>, vector<1x64xf32>
      %c0_64 = arith.constant 0 : index
      %c0_65 = arith.constant 0 : index
      %115 = vector.load %arg4[%c0_64, %c0_65] : memref<1x64xf32, #tpu.memory_space<vmem>>, vector<1x64xf32>
      %cst_66 = arith.constant dense<0.000000e+00> : vector<8xf32>
      %116 = vector.multi_reduction <add>, %113, %cst_66 [1] : vector<8x64xf32> to vector<8xf32>
      %117 = vector.shape_cast %116 : vector<8xf32> to vector<8x1xf32>
      %cst_67 = arith.constant 6.400000e+01 : f32
      %118 = vector.broadcast %cst_67 : f32 to vector<8x1xf32>
      %119 = arith.divf %117, %118 : vector<8x1xf32>
      %120 = vector.broadcast %119 : vector<8x1xf32> to vector<8x64xf32>
      %121 = arith.subf %113, %120 : vector<8x64xf32>
      %122 = arith.mulf %121, %121 : vector<8x64xf32>
      %cst_68 = arith.constant dense<0.000000e+00> : vector<8xf32>
      %123 = vector.multi_reduction <add>, %122, %cst_68 [1] : vector<8x64xf32> to vector<8xf32>
      %124 = vector.shape_cast %123 : vector<8xf32> to vector<8x1xf32>
      %cst_69 = arith.constant 6.400000e+01 : f32
      %125 = vector.broadcast %cst_69 : f32 to vector<8x1xf32>
      %126 = arith.divf %124, %125 : vector<8x1xf32>
      %127 = vector.broadcast %119 : vector<8x1xf32> to vector<8x64xf32>
      %128 = arith.subf %113, %127 : vector<8x64xf32>
      %cst_70 = arith.constant 9.99999974E-6 : f32
      %129 = vector.broadcast %cst_70 : f32 to vector<8x1xf32>
      %130 = arith.addf %126, %129 : vector<8x1xf32>
      %131 = math.rsqrt %130 : vector<8x1xf32>
      %132 = vector.broadcast %131 : vector<8x1xf32> to vector<8x64xf32>
      %133 = arith.mulf %128, %132 : vector<8x64xf32>
      %134 = vector.broadcast %114 : vector<1x64xf32> to vector<8x64xf32>
      %135 = arith.mulf %133, %134 : vector<8x64xf32>
      %136 = vector.broadcast %115 : vector<1x64xf32> to vector<8x64xf32>
      %137 = arith.addf %135, %136 : vector<8x64xf32>
      %c0_71 = arith.constant 0 : index
      %c0_72 = arith.constant 0 : index
      %138 = vector.load %arg18[%c0_71, %c0_72] : memref<8x64xf32, #tpu.memory_space<vmem>>, vector<8x64xf32>
      tpu.vector_store %arg18[%c0_71, %c0_72], %137 {strides = array<i32>} : memref<8x64xf32, #tpu.memory_space<vmem>>, vector<8x64xf32>,
    } else {
    }
    %c0 = arith.constant 0 : index
    %c0_1 = arith.constant 0 : index
    %3 = vector.load %arg18[%c0, %c0_1] : memref<8x64xf32, #tpu.memory_space<vmem>>, vector<8x64xf32>
    %c0_2 = arith.constant 0 : index
    %c0_3 = arith.constant 0 : index
    %c0_4 = arith.constant 0 : index
    %4 = vector.load %arg5[%c0_2, %c0_3, %c0_4] : memref<1x192x64xf32, #tpu.memory_space<vmem>>, vector<1x192x64xf32>
    %5 = vector.shape_cast %4 : vector<1x192x64xf32> to vector<192x64xf32>
    %cst = arith.constant dense<0.000000e+00> : vector<192x8xf32>
    %6 = tpu.matmul %5, %3, %cst {dimension_numbers = #tpu.dot_dimension_numbers<[1], [1], [0], [0], [0, 0, 1, 0], [], []>} : vector<192x64xf32>, vector<8x64xf32>, vector<192x8xf32> -> vector<192x8xf32>
    %c0_5 = arith.constant 0 : index
    %c0_6 = arith.constant 0 : index
    %c0_7 = arith.constant 0 : index
    %7 = vector.load %arg6[%c0_5, %c0_6, %c0_7] : memref<1x192x1xf32, #tpu.memory_space<vmem>>, vector<1x192x1xf32>
    %8 = vector.shape_cast %7 : vector<1x192x1xf32> to vector<192x1xf32>
    %9 = vector.broadcast %8 : vector<192x1xf32> to vector<192x8xf32>
    %10 = arith.addf %6, %9 : vector<192x8xf32>
    %11 = vector.extract_strided_slice %10 {offsets = [0, 0], sizes = [64, 8], strides = [1, 1]} : vector<192x8xf32> to vector<64x8xf32>
    %12 = vector.shape_cast %11 : vector<64x8xf32> to vector<8x8x8xf32>
    %13 = vector.extract_strided_slice %10 {offsets = [64, 0], sizes = [64, 8], strides = [1, 1]} : vector<192x8xf32> to vector<64x8xf32>
    %14 = vector.shape_cast %13 : vector<64x8xf32> to vector<8x8x8xf32>
    %15 = vector.extract_strided_slice %10 {offsets = [128, 0], sizes = [64, 8], strides = [1, 1]} : vector<192x8xf32> to vector<64x8xf32>
    %16 = vector.shape_cast %15 : vector<64x8xf32> to vector<8x8x8xf32>
    "tpu.trace_start"() <{level = 10 : i32, message = "hdq,hdk->hqk"}> : () -> ()
    %cst_8 = arith.constant dense<0.000000e+00> : vector<8x8x8xf32>
    %17 = tpu.matmul %12, %14, %cst_8 {dimension_numbers = #tpu.dot_dimension_numbers<[1], [1], [2], [2], [0, 0, 0, 2, 1, 2], [0], [0]>} : vector<8x8x8xf32>, vector<8x8x8xf32>, vector<8x8x8xf32> -> vector<8x8x8xf32>
    "tpu.trace_stop"() : () -> ()
    %cst_9 = arith.constant dense<0xFF800000> : vector<8x8xf32>
    %18 = vector.multi_reduction <maximumf>, %17, %cst_9 [2] : vector<8x8x8xf32> to vector<8x8xf32>
    %19 = vector.shape_cast %18 : vector<8x8xf32> to vector<8x8x1xf32>
    %20 = vector.broadcast %19 : vector<8x8x1xf32> to vector<8x8x8xf32>
    %21 = arith.subf %17, %20 : vector<8x8x8xf32>
    %22 = math.exp %21 : vector<8x8x8xf32>
    %cst_10 = arith.constant dense<0.000000e+00> : vector<8x8xf32>
    %23 = vector.multi_reduction <add>, %22, %cst_10 [2] : vector<8x8x8xf32> to vector<8x8xf32>
    %24 = vector.shape_cast %23 : vector<8x8xf32> to vector<8x8x1xf32>
    %25 = tpu.reciprocal %24 {approx = true} : vector<8x8x1xf32> -> vector<8x8x1xf32>
    %26 = vector.broadcast %25 : vector<8x8x1xf32> to vector<8x8x8xf32>
    %27 = arith.mulf %22, %26 : vector<8x8x8xf32>
    "tpu.trace_start"() <{level = 10 : i32, message = "hqk,hdk->hdq"}> : () -> ()
    %cst_11 = arith.constant dense<0.000000e+00> : vector<8x8x8xf32>
    %28 = tpu.matmul %16, %27, %cst_11 {dimension_numbers = #tpu.dot_dimension_numbers<[2], [2], [1], [1], [0, 0, 0, 1, 1, 1], [0], [0]>} : vector<8x8x8xf32>, vector<8x8x8xf32>, vector<8x8x8xf32> -> vector<8x8x8xf32>
    "tpu.trace_stop"() : () -> ()
    %29 = vector.shape_cast %28 : vector<8x8x8xf32> to vector<64x8xf32>
    %30 = tpu.transpose %29, [1, 0] : vector<64x8xf32> -> vector<8x64xf32>
    %c0_12 = arith.constant 0 : index
    %c0_13 = arith.constant 0 : index
    %c0_14 = arith.constant 0 : index
    %31 = vector.load %arg7[%c0_12, %c0_13, %c0_14] : memref<1x64x64xf32, #tpu.memory_space<vmem>>, vector<1x64x64xf32>
    %32 = vector.shape_cast %31 : vector<1x64x64xf32> to vector<64x64xf32>
    %cst_15 = arith.constant dense<0.000000e+00> : vector<8x64xf32>
    %33 = tpu.matmul %30, %32, %cst_15 {dimension_numbers = #tpu.dot_dimension_numbers<[1], [0], [0], [1], [0, 0, 1, 1], [], []>} : vector<8x64xf32>, vector<64x64xf32>, vector<8x64xf32> -> vector<8x64xf32>
    %c0_16 = arith.constant 0 : index
    %c0_17 = arith.constant 0 : index
    %c0_18 = arith.constant 0 : index
    %34 = vector.load %arg8[%c0_16, %c0_17, %c0_18] : memref<1x1x64xf32, #tpu.memory_space<vmem>>, vector<1x1x64xf32>
    %35 = vector.shape_cast %34 : vector<1x1x64xf32> to vector<1x64xf32>
    %36 = vector.broadcast %35 : vector<1x64xf32> to vector<8x64xf32>
    %37 = arith.addf %33, %36 : vector<8x64xf32>
    %38 = arith.addf %3, %37 : vector<8x64xf32>
    %c0_19 = arith.constant 0 : index
    %c0_20 = arith.constant 0 : index
    %c0_21 = arith.constant 0 : index
    %39 = vector.load %arg9[%c0_19, %c0_20, %c0_21] : memref<1x1x64xf32, #tpu.memory_space<vmem>>, vector<1x1x64xf32>
    %40 = vector.shape_cast %39 : vector<1x1x64xf32> to vector<1x64xf32>
    %c0_22 = arith.constant 0 : index
    %c0_23 = arith.constant 0 : index
    %c0_24 = arith.constant 0 : index
    %41 = vector.load %arg10[%c0_22, %c0_23, %c0_24] : memref<1x1x64xf32, #tpu.memory_space<vmem>>, vector<1x1x64xf32>
    %42 = vector.shape_cast %41 : vector<1x1x64xf32> to vector<1x64xf32>
    %cst_25 = arith.constant dense<0.000000e+00> : vector<8xf32>
    %43 = vector.multi_reduction <add>, %38, %cst_25 [1] : vector<8x64xf32> to vector<8xf32>
    %44 = vector.shape_cast %43 : vector<8xf32> to vector<8x1xf32>
    %cst_26 = arith.constant 6.400000e+01 : f32
    %45 = vector.broadcast %cst_26 : f32 to vector<8x1xf32>
    %46 = arith.divf %44, %45 : vector<8x1xf32>
    %47 = vector.broadcast %46 : vector<8x1xf32> to vector<8x64xf32>
    %48 = arith.subf %38, %47 : vector<8x64xf32>
    %49 = arith.mulf %48, %48 : vector<8x64xf32>
    %cst_27 = arith.constant dense<0.000000e+00> : vector<8xf32>
    %50 = vector.multi_reduction <add>, %49, %cst_27 [1] : vector<8x64xf32> to vector<8xf32>
    %51 = vector.shape_cast %50 : vector<8xf32> to vector<8x1xf32>
    %cst_28 = arith.constant 6.400000e+01 : f32
    %52 = vector.broadcast %cst_28 : f32 to vector<8x1xf32>
    %53 = arith.divf %51, %52 : vector<8x1xf32>
    %54 = vector.broadcast %46 : vector<8x1xf32> to vector<8x64xf32>
    %55 = arith.subf %38, %54 : vector<8x64xf32>
    %cst_29 = arith.constant 9.99999974E-6 : f32
    %56 = vector.broadcast %cst_29 : f32 to vector<8x1xf32>
    %57 = arith.addf %53, %56 : vector<8x1xf32>
    %58 = math.rsqrt %57 : vector<8x1xf32>
    %59 = vector.broadcast %58 : vector<8x1xf32> to vector<8x64xf32>
    %60 = arith.mulf %55, %59 : vector<8x64xf32>
    %61 = vector.broadcast %40 : vector<1x64xf32> to vector<8x64xf32>
    %62 = arith.mulf %60, %61 : vector<8x64xf32>
    %63 = vector.broadcast %42 : vector<1x64xf32> to vector<8x64xf32>
    %64 = arith.addf %62, %63 : vector<8x64xf32>
    %c0_30 = arith.constant 0 : index
    %c0_31 = arith.constant 0 : index
    %c0_32 = arith.constant 0 : index
    %65 = vector.load %arg11[%c0_30, %c0_31, %c0_32] : memref<1x64x128xf32, #tpu.memory_space<vmem>>, vector<1x64x128xf32>
    %66 = vector.shape_cast %65 : vector<1x64x128xf32> to vector<64x128xf32>
    %cst_33 = arith.constant dense<0.000000e+00> : vector<8x128xf32>
    %67 = tpu.matmul %64, %66, %cst_33 {dimension_numbers = #tpu.dot_dimension_numbers<[1], [0], [0], [1], [0, 0, 1, 1], [], []>} : vector<8x64xf32>, vector<64x128xf32>, vector<8x128xf32> -> vector<8x128xf32>
    %c0_34 = arith.constant 0 : index
    %c0_35 = arith.constant 0 : index
    %c0_36 = arith.constant 0 : index
    %68 = vector.load %arg12[%c0_34, %c0_35, %c0_36] : memref<1x1x128xf32, #tpu.memory_space<vmem>>, vector<1x1x128xf32>
    %69 = vector.shape_cast %68 : vector<1x1x128xf32> to vector<1x128xf32>
    %70 = vector.broadcast %69 : vector<1x128xf32> to vector<8x128xf32>
    %71 = arith.addf %67, %70 : vector<8x128xf32>
    %cst_37 = arith.constant 0.000000e+00 : f32
    %72 = vector.broadcast %cst_37 : f32 to vector<8x128xf32>
    %73 = arith.maximumf %71, %72 : vector<8x128xf32>
    %c0_38 = arith.constant 0 : index
    %c0_39 = arith.constant 0 : index
    %c0_40 = arith.constant 0 : index
    %74 = vector.load %arg13[%c0_38, %c0_39, %c0_40] : memref<1x128x64xf32, #tpu.memory_space<vmem>>, vector<1x128x64xf32>
    %75 = vector.shape_cast %74 : vector<1x128x64xf32> to vector<128x64xf32>
    %cst_41 = arith.constant dense<0.000000e+00> : vector<8x64xf32>
    %76 = tpu.matmul %73, %75, %cst_41 {dimension_numbers = #tpu.dot_dimension_numbers<[1], [0], [0], [1], [0, 0, 1, 1], [], []>} : vector<8x128xf32>, vector<128x64xf32>, vector<8x64xf32> -> vector<8x64xf32>
    %c0_42 = arith.constant 0 : index
    %c0_43 = arith.constant 0 : index
    %c0_44 = arith.constant 0 : index
    %77 = vector.load %arg14[%c0_42, %c0_43, %c0_44] : memref<1x1x64xf32, #tpu.memory_space<vmem>>, vector<1x1x64xf32>
    %78 = vector.shape_cast %77 : vector<1x1x64xf32> to vector<1x64xf32>
    %79 = vector.broadcast %78 : vector<1x64xf32> to vector<8x64xf32>
    %80 = arith.addf %76, %79 : vector<8x64xf32>
    %81 = arith.addf %64, %80 : vector<8x64xf32>
    %c0_45 = arith.constant 0 : index
    %c0_46 = arith.constant 0 : index
    %c0_47 = arith.constant 0 : index
    %82 = vector.load %arg15[%c0_45, %c0_46, %c0_47] : memref<1x1x64xf32, #tpu.memory_space<vmem>>, vector<1x1x64xf32>
    %83 = vector.shape_cast %82 : vector<1x1x64xf32> to vector<1x64xf32>
    %c0_48 = arith.constant 0 : index
    %c0_49 = arith.constant 0 : index
    %c0_50 = arith.constant 0 : index
    %84 = vector.load %arg16[%c0_48, %c0_49, %c0_50] : memref<1x1x64xf32, #tpu.memory_space<vmem>>, vector<1x1x64xf32>
    %85 = vector.shape_cast %84 : vector<1x1x64xf32> to vector<1x64xf32>
    %cst_51 = arith.constant dense<0.000000e+00> : vector<8xf32>
    %86 = vector.multi_reduction <add>, %81, %cst_51 [1] : vector<8x64xf32> to vector<8xf32>
    %87 = vector.shape_cast %86 : vector<8xf32> to vector<8x1xf32>
    %cst_52 = arith.constant 6.400000e+01 : f32
    %88 = vector.broadcast %cst_52 : f32 to vector<8x1xf32>
    %89 = arith.divf %87, %88 : vector<8x1xf32>
    %90 = vector.broadcast %89 : vector<8x1xf32> to vector<8x64xf32>
    %91 = arith.subf %81, %90 : vector<8x64xf32>
    %92 = arith.mulf %91, %91 : vector<8x64xf32>
    %cst_53 = arith.constant dense<0.000000e+00> : vector<8xf32>
    %93 = vector.multi_reduction <add>, %92, %cst_53 [1] : vector<8x64xf32> to vector<8xf32>
    %94 = vector.shape_cast %93 : vector<8xf32> to vector<8x1xf32>
    %cst_54 = arith.constant 6.400000e+01 : f32
    %95 = vector.broadcast %cst_54 : f32 to vector<8x1xf32>
    %96 = arith.divf %94, %95 : vector<8x1xf32>
    %97 = vector.broadcast %89 : vector<8x1xf32> to vector<8x64xf32>
    %98 = arith.subf %81, %97 : vector<8x64xf32>
    %cst_55 = arith.constant 9.99999974E-6 : f32
    %99 = vector.broadcast %cst_55 : f32 to vector<8x1xf32>
    %100 = arith.addf %96, %99 : vector<8x1xf32>
    %101 = math.rsqrt %100 : vector<8x1xf32>
    %102 = vector.broadcast %101 : vector<8x1xf32> to vector<8x64xf32>
    %103 = arith.mulf %98, %102 : vector<8x64xf32>
    %104 = vector.broadcast %83 : vector<1x64xf32> to vector<8x64xf32>
    %105 = arith.mulf %103, %104 : vector<8x64xf32>
    %106 = vector.broadcast %85 : vector<1x64xf32> to vector<8x64xf32>
    %107 = arith.addf %105, %106 : vector<8x64xf32>
    %c0_56 = arith.constant 0 : index
    %c0_57 = arith.constant 0 : index
    %108 = vector.load %arg18[%c0_56, %c0_57] : memref<8x64xf32, #tpu.memory_space<vmem>>, vector<8x64xf32>
    tpu.vector_store %arg18[%c0_56, %c0_57], %107 {strides = array<i32>} : memref<8x64xf32, #tpu.memory_space<vmem>>, vector<8x64xf32>,
    %c1_i32 = arith.constant 1 : i32
    %109 = arith.cmpi eq, %arg1, %c1_i32 : i32
    %110 = arith.extui %109 : i1 to i32
    %c0_i32_58 = arith.constant 0 : i32
    %111 = arith.cmpi ne, %110, %c0_i32_58 : i32
    scf.if %111 {
      %c0_59 = arith.constant 0 : index
      %c0_60 = arith.constant 0 : index
      %c0_61 = arith.constant 0 : index
      %112 = vector.load %arg17[%c0_59, %c0_60, %c0_61] : memref<1x8x64xf32, #tpu.memory_space<vmem>>, vector<1x8x64xf32>
      %113 = vector.shape_cast %112 : vector<1x8x64xf32> to vector<8x64xf32>
      %114 = vector.shape_cast %107 : vector<8x64xf32> to vector<1x8x64xf32>
      tpu.vector_store %arg17[%c0_59, %c0_60, %c0_61], %114 {strides = array<i32>} : memref<1x8x64xf32, #tpu.memory_space<vmem>>, vector<1x8x64xf32>,
    } else {
    }
    return
  }
  func.func @transform_0(%arg0: i32, %arg1: i32) -> (i32, i32, i32) {
    %c0_i32 = arith.constant 0 : i32
    %c0_i32_0 = arith.constant 0 : i32
    %c0_i32_1 = arith.constant 0 : i32
    return %arg0, %c0_i32, %c0_i32_0 : i32, i32, i32
  }
  func.func @transform_1(%arg0: i32, %arg1: i32) -> (i32, i32) {
    %c0_i32 = arith.constant 0 : i32
    %c0_i32_0 = arith.constant 0 : i32
    %c0_i32_1 = arith.constant 0 : i32
    return %c0_i32, %c0_i32_0 : i32, i32
  }
  func.func @transform_2(%arg0: i32, %arg1: i32) -> (i32, i32) {
    %c0_i32 = arith.constant 0 : i32
    %c0_i32_0 = arith.constant 0 : i32
    %c0_i32_1 = arith.constant 0 : i32
    return %c0_i32, %c0_i32_0 : i32, i32
  }
  func.func @transform_3(%arg0: i32, %arg1: i32) -> (i32, i32, i32) {
    %c0_i32 = arith.constant 0 : i32
    %c0_i32_0 = arith.constant 0 : i32
    %c0_i32_1 = arith.constant 0 : i32
    return %arg1, %c0_i32, %c0_i32_0 : i32, i32, i32
  }
  func.func @transform_4(%arg0: i32, %arg1: i32) -> (i32, i32, i32) {
    %c0_i32 = arith.constant 0 : i32
    %c0_i32_0 = arith.constant 0 : i32
    %c0_i32_1 = arith.constant 0 : i32
    return %arg1, %c0_i32, %c0_i32_0 : i32, i32, i32
  }
  func.func @transform_5(%arg0: i32, %arg1: i32) -> (i32, i32, i32) {
    %c0_i32 = arith.constant 0 : i32
    %c0_i32_0 = arith.constant 0 : i32
    %c0_i32_1 = arith.constant 0 : i32
    return %arg1, %c0_i32, %c0_i32_0 : i32, i32, i32
  }
  func.func @transform_6(%arg0: i32, %arg1: i32) -> (i32, i32, i32) {
    %c0_i32 = arith.constant 0 : i32
    %c0_i32_0 = arith.constant 0 : i32
    %c0_i32_1 = arith.constant 0 : i32
    return %arg1, %c0_i32, %c0_i32_0 : i32, i32, i32
  }
  func.func @transform_7(%arg0: i32, %arg1: i32) -> (i32, i32, i32) {
    %c0_i32 = arith.constant 0 : i32
    %c0_i32_0 = arith.constant 0 : i32
    %c0_i32_1 = arith.constant 0 : i32
    return %arg1, %c0_i32, %c0_i32_0 : i32, i32, i32
  }
  func.func @transform_8(%arg0: i32, %arg1: i32) -> (i32, i32, i32) {
    %c0_i32 = arith.constant 0 : i32
    %c0_i32_0 = arith.constant 0 : i32
    %c0_i32_1 = arith.constant 0 : i32
    return %arg1, %c0_i32, %c0_i32_0 : i32, i32, i32
  }
  func.func @transform_9(%arg0: i32, %arg1: i32) -> (i32, i32, i32) {
    %c0_i32 = arith.constant 0 : i32
    %c0_i32_0 = arith.constant 0 : i32
    %c0_i32_1 = arith.constant 0 : i32
    return %arg1, %c0_i32, %c0_i32_0 : i32, i32, i32
  }
  func.func @transform_10(%arg0: i32, %arg1: i32) -> (i32, i32, i32) {
    %c0_i32 = arith.constant 0 : i32
    %c0_i32_0 = arith.constant 0 : i32
    %c0_i32_1 = arith.constant 0 : i32
    return %arg1, %c0_i32, %c0_i32_0 : i32, i32, i32
  }
  func.func @transform_11(%arg0: i32, %arg1: i32) -> (i32, i32, i32) {
    %c0_i32 = arith.constant 0 : i32
    %c0_i32_0 = arith.constant 0 : i32
    %c0_i32_1 = arith.constant 0 : i32
    return %arg1, %c0_i32, %c0_i32_0 : i32, i32, i32
  }
  func.func @transform_12(%arg0: i32, %arg1: i32) -> (i32, i32, i32) {
    %c0_i32 = arith.constant 0 : i32
    %c0_i32_0 = arith.constant 0 : i32
    %c0_i32_1 = arith.constant 0 : i32
    return %arg1, %c0_i32, %c0_i32_0 : i32, i32, i32
  }
  func.func @transform_13(%arg0: i32, %arg1: i32) -> (i32, i32, i32) {
    %c0_i32 = arith.constant 0 : i32
    %c0_i32_0 = arith.constant 0 : i32
    %c0_i32_1 = arith.constant 0 : i32
    return %arg1, %c0_i32, %c0_i32_0 : i32, i32, i32
  }
  func.func @transform_14(%arg0: i32, %arg1: i32) -> (i32, i32, i32) {
    %c0_i32 = arith.constant 0 : i32
    %c0_i32_0 = arith.constant 0 : i32
    %c0_i32_1 = arith.constant 0 : i32
    return %arg1, %c0_i32, %c0_i32_0 : i32, i32, i32
  }
  func.func @transform_15(%arg0: i32, %arg1: i32) -> (i32, i32, i32) {
    %c0_i32 = arith.constant 0 : i32
    %c0_i32_0 = arith.constant 0 : i32
    %c0_i32_1 = arith.constant 0 : i32
    return %arg0, %c0_i32, %c0_i32_0 : i32, i32, i32
  }
}

</mosaic_0001>

<bundles_post_ra>
// kernel: tpu_custom_call.1
= control target key start
LH: loop header
LB: loop body
LE: loop exit
PB: predicated region body
PF: predicated region fallthrough
CT: control target
= control target key end

     0   :  { %s3093_s0 = inlined_call_operand.vmem [shape: f32[2,8,64], index: 0, kind: input, shape index: {}]   ;;  %s3094_s1 = inlined_call_operand.vmem [shape: f32[1,64], index: 1, kind: input, shape index: {}]   ;;  %s3095_s2 = inlined_call_operand.vmem [shape: f32[1,64], index: 2, kind: input, shape index: {}]   ;;  %s3096_s3 = inlined_call_operand.vmem [shape: f32[2,192,64], index: 3, kind: input, shape index: {}]   ;;  %s3097_s4 = inlined_call_operand.vmem [shape: f32[2,192,1], index: 4, kind: input, shape index: {}]   ;;  %s3098_s5 = inlined_call_operand.vmem [shape: f32[2,64,64], index: 5, kind: input, shape index: {}]   ;;  %s3099_s6 = inlined_call_operand.vmem [shape: f32[2,1,64], index: 6, kind: input, shape index: {}]   ;;  %s3100_s7 = inlined_call_operand.vmem [shape: f32[2,1,64], index: 7, kind: input, shape index: {}]   ;;  %s3101_s8 = inlined_call_operand.vmem [shape: f32[2,1,64], index: 8, kind: input, shape index: {}]   ;;  %s3102_s9 = inlined_call_operand.vmem [shape: f32[2,64,128], index: 9, kind: input, shape index: {}]   ;;  %s3103_s10 = inlined_call_operand.vmem [shape: f32[2,1,128], index: 10, kind: input, shape index: {}]   ;;  %s3104_s11 = inlined_call_operand.vmem [shape: f32[2,128,64], index: 11, kind: input, shape index: {}]   ;;  %s3105_s12 = inlined_call_operand.vmem [shape: f32[2,1,64], index: 12, kind: input, shape index: {}]   ;;  %s3106_s13 = inlined_call_operand.vmem [shape: f32[2,1,64], index: 13, kind: input, shape index: {}]   ;;  %s3107_s14 = inlined_call_operand.vmem [shape: f32[2,1,64], index: 14, kind: input, shape index: {}]   ;;  %s3108_s15 = inlined_call_operand.hbm [shape: f32[2,8,64], index: 15, kind: output, shape index: {}]  }
   0x1   :  { %3124 = sst [smem:[#allocation19_spill]] %s3093_s0 }
   0x2   :  { %3125 = sst [smem:[#allocation20_spill]] %s3094_s1 }
   0x3   :  { %3126 = sst [smem:[#allocation21_spill]] %s3095_s2 }
   0x4   :  { %3127 = sst [smem:[#allocation22_spill]] %s3096_s3 }
   0x5   :  { %3128 = sst [smem:[#allocation23_spill]] %s3097_s4 }
   0x6   :  { %3129 = sst [smem:[#allocation24_spill]] %s3098_s5 }
   0x7   :  { %3130 = sst [smem:[#allocation25_spill]] %s3099_s6 }
   0x8   :  { %3131 = sst [smem:[#allocation26_spill]] %s3108_s15 }
   0x9   :  { %20 = vsyncpa [#allocation4], 0 }
   0xa   :  { %22 = vsyncpa [#allocation4 + $0x1], 0  ;;  %s2635_s18 = smov 0   ;;  %s2637_s19 = smov 0  }
   0xb   :  { %s2639_s20 = smov 0   ;;  %s2641_s21 = smov 0  }
   0xc   :  { %s2643_s22 = smov 0   ;;  %s2645_s23 = smov 0  }
   0xd   :  { %s2647_s24 = smov 0   ;;  %s2649_s25 = smov 0  }
   0xe LB: > { %3132 = sst [smem:[#allocation6_spill]] %s2522_s18  ;;  %s2248_s26 = sadd.s32 4294967295, %s2550_s25   ;;  %s2550_s25 = sphi %s2649_s25, %s28_s25   ;;  %s2546_s24 = sphi %s2647_s24, %s3174_s24   ;;  %s2542_s23 = sphi %s2645_s23, %s3173_s23   ;;  %s2538_s22 = sphi %s2643_s22, %s3172_s22   ;;  %s2534_s21 = sphi %s2641_s21, %s3171_s21   ;;  %s2530_s20 = sphi %s2639_s20, %s3170_s20   ;;  %s2526_s19 = sphi %s2637_s19, %s3169_s19   ;;  %s2522_s18 = sphi %s2635_s18, %s3168_s18  }
   0xf   : > { %3133 = sst [smem:[#allocation7_spill]] %s2526_s19  ;;  %s2249_s27 = sadd.s32 4294967294, %s2550_s25  }
  0x10   : > { %3134 = sst [smem:[#allocation8_spill]] %s2530_s20  ;;  %s37_s28 = sadd.s32 1, %s2542_s23 }
  0x11   : > { %3135 = sst [smem:[#allocation9_spill]] %s2534_s21  ;;  %p38_p0 = scmp.ge.s32.totalorder %s37_s28, 2 }
  0x12   : > { %3136 = sst [smem:[#allocation10_spill]] %s2538_s22  ;;  %s40_s29 = sadd.s32 1, %s2546_s24 }
  0x13   : > { %3137 = sst [smem:[#allocation11_spill]] %s2542_s23  ;;  %p437_p1 = scmp.ne.s32.totalorder %s2530_s20, %s2526_s19 }
  0x14   : > { %3138 = sst [smem:[#allocation12_spill]] %s2546_s24  ;;  %p438_p2 = scmp.eq.s32.totalorder %s2248_s26, 3 }
  0x15   : > { %3139 = sst [smem:[#allocation13_spill]] %s2550_s25  ;;  %s3176_s28 = smov (%p38_p0, %s37_s28), 0 }
  0x16   : > { %3140 = sst [smem:[#allocation14_spill]] %s3176_s28  ;;  %s3178_s29 = smov (!%p38_p0, %s40_s29), %s2546_s24 }
  0x17   : > { %p2684_p3 = por %p438_p2, %p437_p1  ;;  %p443_p4 = scmp.ne.s32.totalorder %s2526_s19, %s2522_s18 }
  0x18   : > { %p42_p5 = scmp.ge.s32.totalorder %s3178_s29, 2  ;;  %p444_p6 = scmp.eq.s32.totalorder %s2249_s27, 3 }
  0x19   : > { %s3141_s30 = scalar_select %p2684_p3, 1, 0 }
  0x1a   : > { %p2252_p7 = scmp.ge.s32.totalorder %s2550_s25, 1  ;;  %p557_p8 = scmp.lt.s32.totalorder %s2550_s25, 5 }
  0x1b   : > { %3142 = sst [smem:[#allocation15_spill]] %s3141_s30  ;;  %s3180_s29 = smov (%p42_p5, %s3178_s29), 0 }
  0x1c   : > { %3143 = sst [smem:[#allocation16_spill]] %s3180_s29  ;;  %p2694_p9 = por %p444_p6, %p443_p4 }
  0x1d   : > { %p558_p10 = pnand %p2252_p7, %p557_p8  ;;  %s424_s17 = ssub.s32 %s2546_s24, %s3180_s29 }
  0x1e   : > { %s3144_s16 = scalar_select %p2694_p9, 1, 0 }
  0x1f   : > { %s427_s26 = sadd.s32 1, %s2530_s20  ;;  %p425_p11 = scmp.eq.s32.totalorder %s424_s17, 0 }
  0x20   : > { %3145 = sst [smem:[#allocation17_spill]] %s3144_s16  ;;  %561 = sbr.rel (%p558_p10) target bundleno = 2328 (0x918), region = 80 }
  0x21   : > { %s2702_s28 = scalar_select %p425_p11, %s2530_s20, %s427_s26  }
  0x22   : > { %s3113_s27 = sand.u32 (!%p558_p10), 1, %s2526_s19   ;;  %p650_p12 = scmp.lt.s32.totalorder (!%p558_p10), %s2538_s22, 1 }
  0x23   : > { %3146 = sst [smem:[#allocation18_spill]] %s2702_s28  ;;  %s2708_s23 = sshll.u32 (!%p558_p10), %s3113_s27, 3 }
  0x24   : > { %p654_p13 = scmp.lt.s32.totalorder (!%p558_p10), %s2534_s21, 1  ;;  %s3147_s0 = sld [smem:[#allocation19_spill]] (!%p558_p10) }
  0x25   : > { %s651_s16 = scalar_select %p650_p12, %s2538_s22, 1 }
  0x26   : > { %s2713_s18 = scalar_select %p654_p13, %s2534_s21, 1 }
  0x27   : > { %s2254_s17 = sshll.u32 %s651_s16, 3  ;;  %s3149_s3 = sld [smem:[#allocation22_spill]] }
  0x28   : > { %s2326_s24 = smul.u32 192, %s2713_s18  ;;  %s2320_s28 = sshll.u32 %s2713_s18, 6 }
  0x29   : > { %s3150_s4 = sld [smem:[#allocation23_spill]]  ;;  %s2750_s6 = scalar_lea.vmem %s3102_s9, %s2320_s28 }
  0x2a   : > { %s653_s27 = scalar_lea.vmem %s3147_s0, %s2254_s17  ;;  %s3151_s5 = sld [smem:[#allocation24_spill]] }
  0x2b   : > { %s2322_s29 = sshll.u32 %s2713_s18, 7  ;;  %s693_s15 = scalar_lea.vmem %s3105_s12, %s2713_s18 }
  0x2c   : > { %s699_s20 = scalar_lea.vmem %s3107_s14, %s2713_s18  ;;  %s649_s1 = scalar_lea.vmem [#allocation3], %s2708_s23 }
  0x2d   : > { %s2727_s22 = scalar_lea.vmem %s3149_s3, %s2326_s24  ;;  %s696_s3 = scalar_lea.vmem %s3106_s13, %s2713_s18 }
  0x2e   : > { %s3152_s2 = sld [smem:[#allocation9_spill]] }
  0x2f   : > { %s2732_s16 = scalar_lea.vmem %s3150_s4, %s2326_s24  ;;  %s685_s24 = scalar_lea.vmem %s3103_s10, %s2713_s18 }
  0x30   : > { %s2737_s17 = scalar_lea.vmem %s3151_s5, %s2320_s28  ;;  %s2760_s5 = scalar_lea.vmem %s3104_s11, %s2322_s29 }
  0x34   : > { %p2263_p0 = scmp.ne.s32.totalorder %s3152_s2, 0 }
  0x35   : > { %s3153_s19 = sld [smem:[#allocation20_spill]] (!%p2263_p0) }
  0x36   : > { %703 = sbr.rel (%p2263_p0) target bundleno = 329 (0x149), region = 84  ;;  %s3154_s0 = sld [smem:[#allocation21_spill]] (!%p2263_p0) }
  0x3b   : > { %v704_v0 = vld [vmem:[%s653_s27] sm:$0xff]  ;;  %vm707_vm0 = vcmask 523264   ;;  %v2552_v2 = vmov 64.0  }
  0x3c   : > { %v708_v1 = vsel %vm707_vm0, %v704_v0, 0.0  ;;  %2404 = vrcp.f32 %v2552_v2  ;;  %v2402_v23 = vld [vmem:[%s3153_s19] ss:$0 sm:$0xff] }
  0x3d   : > { %709 = vadd.xlane.f32.xlu0 %v708_v1  ;;  %v2403_v25 = vld [vmem:[%s3154_s0] ss:$0 sm:$0xff] }
  0x42   : > { %v2405_v3 = vpop.eup %2404 }
  0x43   : > { %v712_v4 = vmul.f32 64.0, %v2405_v3  ;;  %vm716_vm1 = vweird.f32 %v2405_v3 }
  0x45   : > { %v713_v5 = vsub.f32 1.0, %v712_v4 }
  0x47   : > { %v714_v6 = vmul.f32 %v2405_v3, %v713_v5 }
  0x49   : > { %v715_v7 = vadd.f32 %v2405_v3, %v714_v6 }
  0x4b   : > { %v717_v8 = vsel %vm716_vm1, %v2405_v3, %v715_v7 }
  0xb0   : > { %v710_v9 = vpop.xlane.xlu0 %709 }
  0xb1   : > { %v718_v10 = vmul.f32 %v717_v8, %v710_v9 }
  0xb3   : > { %v719_v11 = vsub.f32 %v704_v0, %v718_v10 }
  0xb5   : > { %v720_v12 = vmul.f32 %v719_v11, %v719_v11 }
  0xb7   : > { %v721_v13 = vsel %vm707_vm0, %v720_v12, 0.0 }
  0xb8   : > { %722 = vadd.xlane.f32.xlu0 %v721_v13 }
 0x12b   : > { %v723_v14 = vpop.xlane.xlu0 %722 }
 0x12c   : > { %v724_v15 = vmul.f32 %v723_v14, %v717_v8 }
 0x12e   : > { %v725_v16 = vadd.f32 1e-05, %v724_v15 }
 0x130   : > { %2406 = vrsqrt.f32 %v725_v16  ;;  %vm732_vm3 = vweird.f32 %v725_v16 }
 0x136   : > { %v2407_v17 = vpop.eup %2406 }
 0x137   : > { %v727_v18 = vmul.f32 %v2407_v17, %v725_v16  ;;  %vm733_vm2 = vweird.f32 %v2407_v17 }
 0x138   : > { %vm734_vm4 = vmor %vm732_vm3, %vm733_vm2 }
 0x139   : > { %v728_v19 = vmul.f32 %v2407_v17, %v727_v18 }
 0x13b   : > { %v729_v20 = vmul.f32 0.5, %v728_v19 }
 0x13d   : > { %v730_v21 = vsub.f32 1.5, %v729_v20 }
 0x13f   : > { %v731_v22 = vmul.f32 %v2407_v17, %v730_v21 }
 0x141   : > { %v735_v24 = vsel %vm734_vm4, %v2407_v17, %v731_v22 }
 0x142   : > { %v736_v26 = vmul.f32 %v735_v24, %v719_v11 }
 0x144   : > { %v740_v27 = vmul.f32 %v2402_v23, %v736_v26 }
 0x146   : > { %v744_v28 = vadd.f32 %v2403_v25, %v740_v27 }
 0x148   : > { %745 = vst.msk [vmem:[#allocation2] sm:$0xff] %vm707_vm0, %v744_v28 }
 0x149 PF: > { %vm915_vm5 = vcmask 523264   ;;  %v772_v30 = vld [vmem:[%s2732_s16 + $0x8] sm:$0xff]  ;;  %v771_v31 = vld [vmem:[%s2732_s16] sm:$0xff]  ;;  %v2553_v32 = vmov 0   ;;  %v761_v35 = vld [vmem:[%s2727_s22 + $0x70] sm:$0xff]  ;;  %vm1112_vm6 = vcmask 64512   ;;  %s3157_s28 = scalar_lea.vmem %s3100_s7, %s2713_s18  ;;  %s3158_s4 = scalar_lea.vmem %s3101_s8, %s2713_s18 }
 0x14a   : > { %2409 = vset.pattern.permute.xlu1 %v2553_v32  ;;  %2408 = vset.pattern.permute.xlu0 %v2553_v32  ;;  %v747_v33 = vld [vmem:[%s2727_s22] sm:$0xff]  ;;  %v776_v36 = vld [vmem:[%s2732_s16 + $0x28] sm:$0xff]  ;;  %v774_v37 = vld [vmem:[%s2732_s16 + $0x18] sm:$0xff]  ;;  %s3155_s21 = sld [smem:[#allocation25_spill]] }
 0x14b   : > { %802 = vperm.xlu1 %2409, %v772_v30   ;;  %797 = vperm.xlu0 %2408, %v771_v31   ;;  %v759_v34 = vld [vmem:[%s2727_s22 + $0x60] sm:$0xff]  ;;  %v773_v38 = vld [vmem:[%s2732_s16 + $0x10] sm:$0xff]  ;;  %v748_v39 = vld [vmem:[%s2727_s22 + $0x8] sm:$0xff] }
 0x14c   : > { %2410 = vset.pattern.permute.xlu2 %v2553_v32  ;;  %v760_v40 = vld [vmem:[%s2727_s22 + $0x68] sm:$0xff]  ;;  %v775_v41 = vld [vmem:[%s2732_s16 + $0x20] sm:$0xff]  ;;  %v762_v42 = vld [vmem:[%s2727_s22 + $0x78] sm:$0xff] }
 0x14d   : > { %822 = vperm.xlu2 %2410, %v776_v36   ;;  %v781_v43 = vld [vmem:[%s2732_s16 + $0x50] sm:$0xff]  ;;  %v779_v44 = vld [vmem:[%s2732_s16 + $0x40] sm:$0xff]  ;;  %v778_v47 = vld [vmem:[%s2732_s16 + $0x38] sm:$0xff] }
 0x14e   : > { %v749_v45 = vld [vmem:[%s2727_s22 + $0x10] sm:$0xff]  ;;  %v780_v48 = vld [vmem:[%s2732_s16 + $0x48] sm:$0xff]  ;;  %v750_v49 = vld [vmem:[%s2727_s22 + $0x18] sm:$0xff] }
 0x14f   : > { %v2785_v29 = vld [vmem:[#allocation2] sm:$0xff]  ;;  %v777_v46 = vld [vmem:[%s2732_s16 + $0x30] sm:$0xff]  ;;  %v782_v50 = vld [vmem:[%s2732_s16 + $0x58] sm:$0xff] }
 0x150   : > { %2264 = vmatpush.xpose.msk.msra.mxu0 %vm915_vm5, %v2785_v29  ;;  %2323 = vmatpush.xpose.msk.msra.mxu1 %vm915_vm5, %v2785_v29  ;;  %v783_v51 = vld [vmem:[%s2732_s16 + $0x60] sm:$0xff]  ;;  %v784_v52 = vld [vmem:[%s2732_s16 + $0x68] sm:$0xff]  ;;  %v785_v54 = vld [vmem:[%s2732_s16 + $0x70] sm:$0xff]  ;;  %s3156_s25 = scalar_lea.vmem %s3155_s21, %s2713_s18 }
 0x151   : > { %2324 = vmatpush.xpose.msk.msra.mxu2 %vm915_vm5, %v2785_v29  ;;  %2325 = vmatpush.xpose.msk.msra.mxu3 %vm915_vm5, %v2785_v29  ;;  %v751_v53 = vld [vmem:[%s2727_s22 + $0x20] sm:$0xff]  ;;  %v786_v55 = vld [vmem:[%s2732_s16 + $0x78] sm:$0xff]  ;;  %v752_v56 = vld [vmem:[%s2727_s22 + $0x28] sm:$0xff] }
 0x152   : > { %v753_v57 = vld [vmem:[%s2727_s22 + $0x30] sm:$0xff]  ;;  %v754_v58 = vld [vmem:[%s2727_s22 + $0x38] sm:$0xff]  ;;  %v755_v59 = vld [vmem:[%s2727_s22 + $0x40] sm:$0xff] }
 0x153   : > { %2265 = vmatmul.msk.f32.vlgmr.msra.gmra.mxu0 %vm915_vm5, %v747_v33  ;;  %2277 = vmatmul.msk.f32.vlgmr.msra.gmra.mxu1 %vm915_vm5, %v759_v34  ;;  %v756_v60 = vld [vmem:[%s2727_s22 + $0x48] sm:$0xff]  ;;  %v757_v61 = vld [vmem:[%s2727_s22 + $0x50] sm:$0xff]  ;;  %v758_v62 = vld [vmem:[%s2727_s22 + $0x58] sm:$0xff] }
 0x154   : > { %2279 = vmatmul.msk.f32.vlgmr.msra.gmra.mxu2 %vm915_vm5, %v761_v35  ;;  %812 = vperm.xlu1 %2409, %v774_v37   ;;  %v766_v21 = vld [vmem:[%s2727_s22 + $0x98] sm:$0xff]  ;;  %v767_v26 = vld [vmem:[%s2727_s22 + $0xa0] sm:$0xff]  ;;  %v768_v31 = vld [vmem:[%s2727_s22 + $0xa8] sm:$0xff] }
 0x155   : > { %807 = vperm.xlu0 %2408, %v773_v38   ;;  %817 = vperm.xlu2 %2410, %v775_v41   ;;  %v763_v27 = vld [vmem:[%s2727_s22 + $0x80] sm:$0xff]  ;;  %v764_v32 = vld [vmem:[%s2727_s22 + $0x88] sm:$0xff]  ;;  %v769_v38 = vld [vmem:[%s2727_s22 + $0xb0] sm:$0xff] }
 0x156   : > { %2284 = vmatmul.msk.f32.vlgmr.msra.gmra.mxu3 %vm915_vm5, %v766_v21 }
 0x15b   : > { %2266 = vmatmul.msk.f32.gmra.mxu0 %vm915_vm5, %v748_v39  ;;  %2278 = vmatmul.msk.f32.gmra.mxu1 %vm915_vm5, %v760_v40 }
 0x15c   : > { %2280 = vmatmul.msk.f32.gmra.mxu2 %vm915_vm5, %v762_v42  ;;  %847 = vperm.xlu1 %2409, %v781_v43  }
 0x15d   : > { %837 = vperm.xlu0 %2408, %v779_v44   ;;  %827 = vperm.xlu2 %2410, %v777_v46  }
 0x15e   : > { %2285 = vmatmul.msk.f32.gmra.mxu3 %vm915_vm5, %v767_v26 }
 0x163   : > { %2267 = vmatmul.msk.f32.gmra.mxu0 %vm915_vm5, %v749_v45 }
 0x164   : > { %832 = vperm.xlu1 %2409, %v778_v47   ;;  %2281 = vmatmul.msk.f32.gmra.mxu2 %vm915_vm5, %v763_v27 }
 0x165   : > { %842 = vperm.xlu0 %2408, %v780_v48   ;;  %852 = vperm.xlu2 %2410, %v782_v50   ;;  %v770_v48 = vld [vmem:[%s2727_s22 + $0xb8] sm:$0xff]  ;;  %v787_v50 = vld [vmem:[%s2732_s16 + $0x80] sm:$0xff] }
 0x166   : > { %2286 = vmatmul.msk.f32.gmra.mxu3 %vm915_vm5, %v768_v31 }
 0x16b   : > { %2268 = vmatmul.msk.f32.gmra.mxu0 %vm915_vm5, %v750_v49  ;;  %v765_v49 = vld [vmem:[%s2727_s22 + $0x90] sm:$0xff]  ;;  %s3159_s22 = sld [smem:[#allocation9_spill]] }
 0x16c   : > { %857 = vperm.xlu1 %2409, %v783_v51   ;;  %2282 = vmatmul.msk.f32.gmra.mxu2 %vm915_vm5, %v764_v32 }
 0x16d   : > { %862 = vperm.xlu0 %2408, %v784_v52   ;;  %867 = vperm.xlu2 %2410, %v785_v54  }
 0x16e   : > { %2287 = vmatmul.msk.f32.gmra.mxu3 %vm915_vm5, %v769_v38 }
 0x171   : > { %p2315_p1 = scmp.ne.s32.totalorder %s3159_s22, 1 }
 0x173   : > { %2269 = vmatmul.msk.f32.gmra.mxu0 %vm915_vm5, %v751_v53 }
 0x174   : > { %2283 = vmatmul.msk.f32.gmra.mxu2 %vm915_vm5, %v765_v49 }
 0x175   : > { %872 = vperm.xlu0 %2408, %v786_v55  }
 0x176   : > { %2288 = vmatmul.msk.f32.gmra.mxu3 %vm915_vm5, %v770_v48 }
 0x17b   : > { %2270 = vmatmul.msk.f32.gmra.mxu0 %vm915_vm5, %v752_v56 }
 0x183   : > { %2271 = vmatmul.msk.f32.gmra.mxu0 %vm915_vm5, %v753_v57 }
 0x18b   : > { %2272 = vmatmul.msk.f32.gmra.mxu0 %vm915_vm5, %v754_v58 }
 0x193   : > { %2273 = vmatmul.msk.f32.gmra.mxu0 %vm915_vm5, %v755_v59 }
 0x19b   : > { %2274 = vmatmul.msk.f32.gmra.mxu0 %vm915_vm5, %v756_v60 }
 0x1a3   : > { %2275 = vmatmul.msk.f32.gmra.mxu0 %vm915_vm5, %v757_v61 }
 0x1a7   : > { %v823_v8 = vpop.permute.xlu2 %822 }
 0x1ab   : > { %2276 = vmatmul.msk.f32.gmra.mxu0 %vm915_vm5, %v758_v62 }
 0x1af   : > { %v818_v12 = vpop.permute.xlu2 %817 }
 0x1b7   : > { %v828_v18 = vpop.permute.xlu2 %827 }
 0x1bd   : > { %v798_v63 = vpop.permute.xlu0 %797  ;;  %v803_v2 = vpop.permute.xlu1 %802 }
 0x1bf   : > { %v853_v45 = vpop.permute.xlu2 %852 }
 0x1c6   : > { %v813_v9 = vpop.permute.xlu1 %812 }
 0x1c7   : > { %v808_v5 = vpop.permute.xlu0 %807  ;;  %v868_v52 = vpop.permute.xlu2 %867 }
 0x1ce   : > { %v848_v17 = vpop.permute.xlu1 %847 }
 0x1cf   : > { %v838_v25 = vpop.permute.xlu0 %837 }
 0x1d0   : > { %v1008_v0 = vpop.f32.mrf.mxu0  ;;  %v1044_v34 = vpop.f32.mrf.mxu1 }
 0x1d1   : > { %v1009_v1 = vadd.f32 %v1008_v0, %v798_v63 }
 0x1d3   : > { %1080 = vxpose.xlu1.b32.start.end [1/1] (short) (narrow) %v1009_v1, 8 }
 0x1d6   : > { %v833_v22 = vpop.permute.xlu1 %832 }
 0x1d7   : > { %v843_v33 = vpop.permute.xlu0 %842  ;;  %v1050_v51 = vpop.f32.mrf.mxu2 }
 0x1d8   : > { %v1011_v3 = vpop.f32.mrf.mxu0  ;;  %v1047_v41 = vpop.f32.mrf.mxu1  ;;  %v1051_v53 = vadd.f32 %v1050_v51, %v868_v52  ;;  %v788_v52 = vld [vmem:[%s2732_s16 + $0x88] sm:$0xff] }
 0x1d9   : > { %v1012_v4 = vadd.f32 %v1011_v3, %v803_v2  ;;  %v2868_v1 = vpop.f32.mrf.mxu3 }
 0x1db   : > { %1136 = vxpose.xlu0.b32.start.end [1/1] (short) (narrow) %v1012_v4, 8 }
 0x1de   : > { %v858_v35 = vpop.permute.xlu1 %857 }
 0x1df   : > { %v1045_v39 = vadd.f32 %v1044_v34, %v858_v35  ;;  %v863_v40 = vpop.permute.xlu0 %862  ;;  %v1053_v56 = vpop.f32.mrf.mxu2 }
 0x1e0   : > { %v1014_v6 = vpop.f32.mrf.mxu0  ;;  %v1048_v44 = vadd.f32 %v1047_v41, %v863_v40 }
 0x1e1   : > { %v1015_v7 = vadd.f32 %v1014_v6, %v808_v5  ;;  %v2870_v2 = vpop.f32.mrf.mxu3 }
 0x1e3   : > { %1191 = vxpose.xlu2.b32.start.end [1/1] (short) (narrow) %v1015_v7, 8 }
 0x1e7   : > { %v873_v54 = vpop.permute.xlu0 %872  ;;  %v2874_v4 = vpop.f32.mrf.mxu2 }
 0x1e8   : > { %v1017_v10 = vpop.f32.mrf.mxu0  ;;  %v1054_v58 = vadd.f32 %v1053_v56, %v873_v54  ;;  %v789_v54 = vld [vmem:[%s2732_s16 + $0x90] sm:$0xff]  ;;  %v790_v56 = vld [vmem:[%s2732_s16 + $0x98] sm:$0xff] }
 0x1e9   : > { %v1018_v11 = vadd.f32 %v1017_v10, %v813_v9  ;;  %v2872_v3 = vpop.f32.mrf.mxu3 }
 0x1eb   : > { %1246 = vxpose.xlu2.b32.start.end [1/1] (short) (narrow) %v1018_v11, 8 }
 0x1ef   : > { %v2878_v6 = vpop.f32.mrf.mxu2 }
 0x1f0   : > { %v1020_v13 = vpop.f32.mrf.mxu0 }
 0x1f1   : > { %v1021_v14 = vadd.f32 %v1020_v13, %v818_v12  ;;  %v2876_v5 = vpop.f32.mrf.mxu3 }
 0x1f3   : > { %1301 = vxpose.xlu2.b32.start.end [1/1] (short) (narrow) %v1021_v14, 8 }
 0x1f7   : > { %v2883_v10 = vpop.f32.mrf.mxu2 }
 0x1f8   : > { %v1023_v15 = vpop.f32.mrf.mxu0 }
 0x1f9   : > { %v1024_v16 = vadd.f32 %v1023_v15, %v823_v8  ;;  %v2881_v9 = vpop.f32.mrf.mxu3 }
 0x1fb   : > { %1356 = vxpose.xlu0.b32.start.end [1/1] (short) (narrow) %v1024_v16, 8 }
 0x200   : > { %v1026_v19 = vpop.f32.mrf.mxu0 }
 0x201   : > { %v1027_v20 = vadd.f32 %v1026_v19, %v828_v18 }
 0x203   : > { %1411 = vxpose.xlu0.b32.start.end [1/1] (short) (narrow) %v1027_v20, 8 }
 0x208   : > { %v1029_v23 = vpop.f32.mrf.mxu0 }
 0x209   : > { %v1030_v24 = vadd.f32 %v1029_v23, %v833_v22 }
 0x20b   : > { %1466 = vxpose.xlu1.b32.start.end [1/1] (short) (narrow) %v1030_v24, 8 }
 0x210   : > { %v1032_v28 = vpop.f32.mrf.mxu0 }
 0x211   : > { %v1033_v30 = vadd.f32 %v1032_v28, %v838_v25 }
 0x213   : > { %1131 = vmatpush.msrb.mxu1 %v1033_v30 }
 0x218   : > { %v1035_v36 = vpop.f32.mrf.mxu0 }
 0x219   : > { %v1036_v37 = vadd.f32 %v1035_v36, %v843_v33 }
 0x21b   : > { %1186 = vmatpush.msrb.mxu2 %v1036_v37 }
 0x21d   : > { %1351 = vmatpush.msra.mxu2 %v1045_v39 }
 0x220   : > { %v1038_v42 = vpop.f32.mrf.mxu0 }
 0x221   : > { %v1039_v43 = vadd.f32 %v1038_v42, %v848_v17 }
 0x223   : > { %1241 = vmatpush.msrb.mxu3 %v1039_v43 }
 0x225   : > { %1406 = vmatpush.msra.mxu3 %v1048_v44 }
 0x228   : > { %v1041_v46 = vpop.f32.mrf.mxu0 }
 0x229   : > { %v1042_v47 = vadd.f32 %v1041_v46, %v853_v45 }
 0x22b   : > { %1296 = vmatpush.msra.mxu1 %v1042_v47 }
 0x271   : > { %877 = vperm.xlu0 %2408, %v787_v50  }
 0x277   : > { %v1096_v55 = vpop.trf.xlu1 }
 0x278   : > { %2289 = vmatmul.msk.f32.vlgmr.msrb.gmra.mxu1 %vm1112_vm6, %v1096_v55  ;;  %v791_v55 = vld [vmem:[%s2732_s16 + $0xa0] sm:$0xff] }
 0x279   : > { %1461 = vmatpush.msrb.mxu1 %v1051_v53  ;;  %v792_v53 = vld [vmem:[%s2732_s16 + $0xa8] sm:$0xff] }
 0x27c   : > { %v1207_v57 = vpop.trf.xlu2 }
 0x27d   : > { %2291 = vmatmul.msk.f32.vlgmr.msrb.gmra.mxu3 %vm1112_vm6, %v1207_v57  ;;  %v793_v57 = vld [vmem:[%s2732_s16 + $0xb0] sm:$0xff] }
 0x27f   : > { %v1152_v59 = vpop.trf.xlu0 }
 0x280   : > { %2290 = vmatmul.msk.f32.vlgmr.msrb.gmra.mxu2 %vm1112_vm6, %v1152_v59 }
 0x281   : > { %1516 = vmatpush.msrb.mxu2 %v1054_v58 }
 0x284   : > { %v1262_v60 = vpop.trf.xlu2 }
 0x285   : > { %2292 = vmatmul.msk.f32.vlgmr.msra.gmra.mxu1 %vm1112_vm6, %v1262_v60 }
 0x28c   : > { %v1317_v61 = vpop.trf.xlu2 }
 0x28d   : > { %2293 = vmatmul.msk.f32.vlgmr.msra.gmra.mxu2 %vm1112_vm6, %v1317_v61 }
 0x29f   : > { %v1372_v62 = vpop.trf.xlu0 }
 0x2a0   : > { %2294 = vmatmul.msk.f32.vlgmr.msra.gmra.mxu3 %vm1112_vm6, %v1372_v62 }
 0x2a7   : > { %v1427_v63 = vpop.trf.xlu0 }
 0x2a8   : > { %2295 = vmatmul.msk.f32.vlgmr.msrb.gmra.mxu1 %vm1112_vm6, %v1427_v63 }
 0x2af   : > { %v1482_v0 = vpop.trf.xlu1 }
 0x2b0   : > { %2296 = vmatmul.msk.f32.vlgmr.msrb.gmra.mxu2 %vm1112_vm6, %v1482_v0 }
 0x2e3   : > { %v2898_v27 = vpop.permute.xlu0 %877 }
 0x2f5   : > { %v1133_v7 = vpop.f32.mrf.mxu1 }
 0x2f6   : > { %v1521_v8 = vsel %vm1112_vm6, %v1133_v7, -inf }
 0x2f7   : > { %1522 = vmax.xlane.f32.xlu2 %v1521_v8 }
 0x300   : > { %v1243_v11 = vpop.f32.mrf.mxu3 }
 0x301   : > { %v1527_v12 = vsel %vm1112_vm6, %v1243_v11, -inf }
 0x302   : > { %1528 = vmax.xlane.f32.xlu0 %v1527_v12  ;;  %v1298_v15 = vpop.f32.mrf.mxu1 }
 0x303   : > { %v1188_v13 = vpop.f32.mrf.mxu2  ;;  %v1530_v16 = vsel %vm1112_vm6, %v1298_v15, -inf }
 0x304   : > { %v1524_v14 = vsel %vm1112_vm6, %v1188_v13, -inf }
 0x305   : > { %1525 = vmax.xlane.f32.xlu1 %v1524_v14 }
 0x30d   : > { %1531 = vmax.xlane.f32.xlu1 %v1530_v16 }
 0x310   : > { %v1353_v17 = vpop.f32.mrf.mxu2 }
 0x311   : > { %v1533_v18 = vsel %vm1112_vm6, %v1353_v17, -inf }
 0x312   : > { %1534 = vmax.xlane.f32.xlu2 %v1533_v18 }
 0x323   : > { %v2889_v19 = vpop.f32.mrf.mxu3 }
 0x324   : > { %v1536_v20 = vsel %vm1112_vm6, %v2889_v19, -inf }
 0x325   : > { %1537 = vmax.xlane.f32.xlu1 %v1536_v20  ;;  %v2893_v21 = vpop.f32.mrf.mxu1  ;;  %v794_v20 = vld [vmem:[%s2732_s16 + $0xb8] sm:$0xff] }
 0x326   : > { %v1539_v22 = vsel %vm1112_vm6, %v2893_v21, -inf }
 0x327   : > { %1540 = vmax.xlane.f32.xlu0 %v1539_v22 }
 0x333   : > { %v1518_v23 = vpop.f32.mrf.mxu2 }
 0x334   : > { %v1542_v24 = vsel %vm1112_vm6, %v1518_v23, -inf }
 0x335   : > { %1543 = vmax.xlane.f32.xlu1 %v1542_v24 }
 0x36a   : > { %v1523_v25 = vpop.xlane.xlu2 %1522 }
 0x36b   : > { %v1545_v26 = vsub.f32 %v1133_v7, %v1523_v25 }
 0x36d   : > { %v1553_v28 = vmul.f32 1.442695, %v1545_v26 }
 0x36f   : > { %2418 = vpow2.f32 %v1553_v28 }
 0x375   : > { %v2900_v30 = vpop.eup %2418  ;;  %v1529_v31 = vpop.xlane.xlu0 %1528 }
 0x376   : > { %v1547_v32 = vsub.f32 %v1243_v11, %v1529_v31  ;;  %v1569_v33 = vsel %vm1112_vm6, %v2900_v30, 0.0 }
 0x377   : > { %1570 = vadd.xlane.f32.xlu2 %v1569_v33 }
 0x378   : > { %v1557_v34 = vmul.f32 1.442695, %v1547_v32  ;;  %v1526_v35 = vpop.xlane.xlu1 %1525 }
 0x379   : > { %v1546_v36 = vsub.f32 %v1188_v13, %v1526_v35 }
 0x37a   : > { %2420 = vpow2.f32 %v1557_v34 }
 0x37b   : > { %v1555_v37 = vmul.f32 1.442695, %v1546_v36 }
 0x37d   : > { %2422 = vpow2.f32 %v1555_v37 }
 0x380   : > { %v2904_v38 = vpop.eup %2420  ;;  %v1532_v39 = vpop.xlane.xlu1 %1531 }
 0x381   : > { %v1548_v40 = vsub.f32 %v1298_v15, %v1532_v39  ;;  %v1575_v41 = vsel %vm1112_vm6, %v2904_v38, 0.0 }
 0x382   : > { %1576 = vadd.xlane.f32.xlu0 %v1575_v41 }
 0x383   : > { %v2908_v42 = vpop.eup %2422  ;;  %v1559_v43 = vmul.f32 1.442695, %v1548_v40 }
 0x384   : > { %v1572_v44 = vsel %vm1112_vm6, %v2908_v42, 0.0 }
 0x385   : > { %2424 = vpow2.f32 %v1559_v43  ;;  %v1535_v45 = vpop.xlane.xlu2 %1534  ;;  %1573 = vadd.xlane.f32.xlu1 %v1572_v44 }
 0x386   : > { %v1549_v46 = vsub.f32 %v1353_v17, %v1535_v45 }
 0x388   : > { %v1561_v47 = vmul.f32 1.442695, %v1549_v46 }
 0x38a   : > { %2426 = vpow2.f32 %v1561_v47 }
 0x38b   : > { %v2912_v48 = vpop.eup %2424 }
 0x38c   : > { %v1578_v49 = vsel %vm1112_vm6, %v2912_v48, 0.0 }
 0x38d   : > { %1579 = vadd.xlane.f32.xlu2 %v1578_v49 }
 0x390   : > { %v2916_v50 = vpop.eup %2426 }
 0x391   : > { %v1581_v51 = vsel %vm1112_vm6, %v2916_v50, 0.0 }
 0x392   : > { %1582 = vadd.xlane.f32.xlu1 %v1581_v51 }
 0x396   : > { %882 = vperm.xlu0 %2408, %v788_v52  }
 0x398   : > { %v1538_v58 = vpop.xlane.xlu1 %1537 }
 0x399   : > { %v1550_v62 = vsub.f32 %v2889_v19, %v1538_v58  ;;  %v1853_v58 = vld [vmem:[%s2737_s17 + $0x20] sm:$0xff] }
 0x39a   : > { %v1541_v0 = vpop.xlane.xlu0 %1540 }
 0x39b   : > { %v1563_v63 = vmul.f32 1.442695, %v1550_v62  ;;  %v1551_v8 = vsub.f32 %v2893_v21, %v1541_v0  ;;  %v1057_v21 = vadd.f32 %v2874_v4, %v2898_v27  ;;  %v1849_v62 = vld [vmem:[%s2737_s17] sm:$0xff] }
 0x39d   : > { %v1565_v12 = vmul.f32 1.442695, %v1551_v8 }
 0x39e   : > { %902 = vperm.xlu0 %2408, %v792_v53  }
 0x3a5   : > { %887 = vperm.xlu2 %2410, %v789_v54  }
 0x3a6   : > { %897 = vperm.xlu0 %2408, %v791_v55  }
 0x3a8   : > { %v1544_v59 = vpop.xlane.xlu1 %1543 }
 0x3a9   : > { %v1552_v60 = vsub.f32 %v1518_v23, %v1544_v59  ;;  %v1852_v59 = vld [vmem:[%s2737_s17 + $0x18] sm:$0xff] }
 0x3ab   : > { %892 = vperm.xlu1 %2409, %v790_v56   ;;  %v1567_v61 = vmul.f32 1.442695, %v1552_v60  ;;  %v1856_v56 = vld [vmem:[%s2737_s17 + $0x38] sm:$0xff]  ;;  %v1851_v60 = vld [vmem:[%s2737_s17 + $0x10] sm:$0xff] }
 0x3ad   : > { %2428 = vpow2.f32 %v1567_v61  ;;  %v1850_v61 = vld [vmem:[%s2737_s17 + $0x8] sm:$0xff] }
 0x3ae   : > { %907 = vperm.xlu0 %2408, %v793_v57   ;;  %2430 = vpow2.f32 %v1563_v63  ;;  %v1855_v57 = vld [vmem:[%s2737_s17 + $0x30] sm:$0xff] }
 0x3af   : > { %2432 = vpow2.f32 %v1565_v12 }
 0x3b3   : > { %v2429_v7 = vpop.eup %2428 }
 0x3b4   : > { %v1590_v11 = vsel %vm1112_vm6, %v2429_v7, 0.0  ;;  %v2431_v13 = vpop.eup %2430 }
 0x3b5   : > { %v1584_v14 = vsel %vm1112_vm6, %v2431_v13, 0.0  ;;  %v2433_v15 = vpop.eup %2432 }
 0x3b6   : > { %v1587_v16 = vsel %vm1112_vm6, %v2433_v15, 0.0 }
 0x3ce   : > { %1591 = vadd.xlane.f32.xlu2 %v1590_v11  ;;  %v2411_v11 = vld [vmem:[%s3156_s25] ss:$0 sm:$0xff] }
 0x3d5   : > { %1585 = vadd.xlane.f32.xlu1 %v1584_v14 }
 0x3dd   : > { %1588 = vadd.xlane.f32.xlu1 %v1587_v16  ;;  %v2554_v16 = vmov 64.0  }
 0x3ea   : > { %v1571_v17 = vpop.xlane.xlu2 %1570 }
 0x3eb   : > { %2434 = vrcp.f32 %v1571_v17 }
 0x3f1   : > { %v2435_v18 = vpop.eup %2434 }
 0x3f2   : > { %v1601_v19 = vmul.f32 %v2435_v18, %v2900_v30 }
 0x3f4   : > { %2297 = vmatpush.xpose.msk.msrb.mxu3 %vm1112_vm6, %v1601_v19 }
 0x3f5   : > { %v1577_v22 = vpop.xlane.xlu0 %1576 }
 0x3f6   : > { %2436 = vrcp.f32 %v1577_v22  ;;  %912 = vperm.xlu1 %2409, %v794_v20  }
 0x3f7   : > { %2298 = vmatmul.msk.f32.vlgmr.msrb.gmra.mxu3 %vm1112_vm6, %v1057_v21 }
 0x3f8   : > { %v1574_v23 = vpop.xlane.xlu1 %1573 }
 0x3f9   : > { %2438 = vrcp.f32 %v1574_v23 }
 0x3fc   : > { %v2437_v24 = vpop.eup %2436 }
 0x3fd   : > { %v1603_v25 = vmul.f32 %v2437_v24, %v2904_v38 }
 0x3ff   : > { %v2439_v26 = vpop.eup %2438  ;;  %2301 = vmatpush.xpose.msk.msra.mxu2 %vm1112_vm6, %v1603_v25 }
 0x400   : > { %v1602_v28 = vmul.f32 %v2439_v26, %v2908_v42  ;;  %v1580_v30 = vpop.xlane.xlu2 %1579 }
 0x401   : > { %2440 = vrcp.f32 %v1580_v30  ;;  %v1930_v30 = vld [vmem:[%s2750_s6 + $0x30] sm:$0xff] }
 0x402   : > { %2299 = vmatpush.xpose.msk.msra.mxu1 %vm1112_vm6, %v1602_v28  ;;  %v1931_v28 = vld [vmem:[%s2750_s6 + $0x38] sm:$0xff] }
 0x405   : > { %v1583_v4 = vpop.xlane.xlu1 %1582 }
 0x406   : > { %2442 = vrcp.f32 %v1583_v4  ;;  %v1929_v4 = vld [vmem:[%s2750_s6 + $0x28] sm:$0xff] }
 0x407   : > { %v2441_v27 = vpop.eup %2440 }
 0x408   : > { %v1604_v31 = vmul.f32 %v2441_v27, %v2912_v48  ;;  %v883_v32 = vpop.permute.xlu0 %882  ;;  %v888_v33 = vpop.permute.xlu2 %887  ;;  %v1928_v27 = vld [vmem:[%s2750_s6 + $0x20] sm:$0xff] }
 0x409   : > { %v1060_v34 = vadd.f32 %v2878_v6, %v883_v32  ;;  %v1063_v35 = vadd.f32 %v2883_v10, %v888_v33  ;;  %v1926_v32 = vld [vmem:[%s2750_s6 + $0x10] sm:$0xff]  ;;  %v1925_v33 = vld [vmem:[%s2750_s6 + $0x8] sm:$0xff] }
 0x40a   : > { %2303 = vmatpush.xpose.msk.msra.mxu3 %vm1112_vm6, %v1604_v31  ;;  %v1927_v31 = vld [vmem:[%s2750_s6 + $0x18] sm:$0xff] }
 0x40b   : > { %2300 = vmatmul.msk.f32.vlgmr.msra.gmra.mxu1 %vm1112_vm6, %v1060_v34  ;;  %2302 = vmatmul.msk.f32.vlgmr.msra.gmra.mxu2 %vm1112_vm6, %v1063_v35  ;;  %v1924_v34 = vld [vmem:[%s2750_s6] sm:$0xff]  ;;  %v1975_v35 = vld [vmem:[%s2760_s5 + $0x78] sm:$0xff] }
 0x40c   : > { %v2443_v36 = vpop.eup %2442 }
 0x40d   : > { %v1605_v37 = vmul.f32 %v2443_v36, %v2916_v50  ;;  %v1974_v36 = vld [vmem:[%s2760_s5 + $0x70] sm:$0xff] }
 0x40f   : > { %2305 = vmatpush.xpose.msk.msrb.mxu1 %vm1112_vm6, %v1605_v37  ;;  %v1973_v37 = vld [vmem:[%s2760_s5 + $0x68] sm:$0xff] }
 0x410   : > { %v903_v38 = vpop.permute.xlu0 %902 }
 0x418   : > { %v898_v39 = vpop.permute.xlu0 %897 }
 0x419   : > { %v1069_v40 = vadd.f32 %v2870_v2, %v898_v39  ;;  %v1072_v2 = vadd.f32 %v2872_v3, %v903_v38 }
 0x41b   : > { %2306 = vmatmul.msk.f32.vlgmr.msrb.gmra.mxu1 %vm1112_vm6, %v1069_v40  ;;  %v1972_v40 = vld [vmem:[%s2760_s5 + $0x60] sm:$0xff] }
 0x41d   : > { %v893_v6 = vpop.permute.xlu1 %892 }
 0x41e   : > { %v1066_v10 = vadd.f32 %v2868_v1, %v893_v6 }
 0x420   : > { %2304 = vmatmul.msk.f32.vlgmr.msra.gmra.mxu3 %vm1112_vm6, %v1066_v10  ;;  %v908_v48 = vpop.permute.xlu0 %907  ;;  %v1971_v10 = vld [vmem:[%s2760_s5 + $0x58] sm:$0xff] }
 0x421   : > { %v1075_v50 = vadd.f32 %v2876_v5, %v908_v48 }
 0x441   : > { %v1592_v41 = vpop.xlane.xlu2 %1591 }
 0x442   : > { %2444 = vrcp.f32 %v1592_v41  ;;  %v1970_v41 = vld [vmem:[%s2760_s5 + $0x50] sm:$0xff] }
 0x448   : > { %v2445_v42 = vpop.eup %2444  ;;  %v1586_v43 = vpop.xlane.xlu1 %1585 }
 0x449   : > { %v1608_v44 = vmul.f32 %v2445_v42, %v2429_v7  ;;  %2446 = vrcp.f32 %v1586_v43  ;;  %v1969_v42 = vld [vmem:[%s2760_s5 + $0x48] sm:$0xff]  ;;  %v1968_v43 = vld [vmem:[%s2760_s5 + $0x40] sm:$0xff] }
 0x44b   : > { %2311 = vmatpush.xpose.msk.msra.mxu1 %vm1112_vm6, %v1608_v44 }
 0x44f   : > { %v2447_v45 = vpop.eup %2446  ;;  %1980 = vmatpush.msrb.mxu1 %v1975_v35 }
 0x450   : > { %v1606_v46 = vmul.f32 %v2447_v45, %v2431_v13  ;;  %v1589_v47 = vpop.xlane.xlu1 %1588  ;;  %v1967_v45 = vld [vmem:[%s2760_s5 + $0x38] sm:$0xff] }
 0x451   : > { %2448 = vrcp.f32 %v1589_v47  ;;  %1981 = vmatpush.msrb.mxu1 %v1974_v36  ;;  %v1966_v47 = vld [vmem:[%s2760_s5 + $0x30] sm:$0xff] }
 0x452   : > { %2307 = vmatpush.xpose.msk.msrb.mxu2 %vm1112_vm6, %v1606_v46  ;;  %2450 = vrcp.f32 %v2554_v16 }
 0x453   : > { %1982 = vmatpush.msrb.mxu1 %v1973_v37 }
 0x455   : > { %2308 = vmatmul.msk.f32.vlgmr.msrb.gmra.mxu2 %vm1112_vm6, %v1072_v2  ;;  %1983 = vmatpush.msrb.mxu1 %v1972_v40 }
 0x456   : > { %1872 = vmatpush.msra.mxu2 %v1856_v56 }
 0x457   : > { %v2449_v1 = vpop.eup %2448  ;;  %1984 = vmatpush.msrb.mxu1 %v1971_v10 }
 0x458   : > { %v1607_v49 = vmul.f32 %v2449_v1, %v2433_v15  ;;  %1873 = vmatpush.msra.mxu2 %v1855_v57  ;;  %v2451_v17 = vpop.eup %2450  ;;  %v1965_v1 = vld [vmem:[%s2760_s5 + $0x28] sm:$0xff]  ;;  %v1962_v57 = vld [vmem:[%s2760_s5 + $0x10] sm:$0xff] }
 0x459   : > { %v1891_v18 = vmul.f32 64.0, %v2451_v17  ;;  %vm1895_vm7 = vweird.f32 %v2451_v17  ;;  %1985 = vmatpush.msrb.mxu1 %v1970_v41 }
 0x45a   : > { %2309 = vmatpush.xpose.msk.msrb.mxu3 %vm1112_vm6, %v1607_v49  ;;  %v1964_v49 = vld [vmem:[%s2760_s5 + $0x20] sm:$0xff] }
 0x45b   : > { %v1892_v19 = vsub.f32 1.0, %v1891_v18  ;;  %1986 = vmatpush.msrb.mxu1 %v1969_v42 }
 0x45d   : > { %2310 = vmatmul.msk.f32.vlgmr.msrb.gmra.mxu3 %vm1112_vm6, %v1075_v50  ;;  %v1893_v20 = vmul.f32 %v2451_v17, %v1892_v19  ;;  %1987 = vmatpush.msrb.mxu1 %v1968_v43 }
 0x45e   : > { %1947 = vmatpush.msra.mxu3 %v1931_v28 }
 0x45f   : > { %v1894_v21 = vadd.f32 %v2451_v17, %v1893_v20  ;;  %1988 = vmatpush.msrb.mxu1 %v1967_v45 }
 0x460   : > { %1948 = vmatpush.msra.mxu3 %v1930_v30 }
 0x461   : > { %v2978_v22 = vsel %vm1895_vm7, %v2451_v17, %v1894_v21  ;;  %1989 = vmatpush.msrb.mxu1 %v1966_v47 }
 0x462   : > { %1949 = vmatpush.msra.mxu3 %v1929_v4 }
 0x463   : > { %1990 = vmatpush.msrb.mxu1 %v1965_v1 }
 0x464   : > { %1950 = vmatpush.msra.mxu3 %v1928_v27 }
 0x465   : > { %1991 = vmatpush.msrb.mxu1 %v1964_v49 }
 0x466   : > { %1951 = vmatpush.msra.mxu3 %v1927_v31 }
 0x468   : > { %v913_v51 = vpop.permute.xlu1 %912  ;;  %1952 = vmatpush.msra.mxu3 %v1926_v32 }
 0x469   : > { %v1078_v52 = vadd.f32 %v2881_v9, %v913_v51  ;;  %v1854_v9 = vld [vmem:[%s2737_s17 + $0x28] sm:$0xff]  ;;  %v1963_v51 = vld [vmem:[%s2760_s5 + $0x18] sm:$0xff] }
 0x46a   : > { %1874 = vmatpush.msra.mxu2 %v1854_v9  ;;  %1953 = vmatpush.msra.mxu3 %v1925_v33  ;;  %v1961_v9 = vld [vmem:[%s2760_s5 + $0x8] sm:$0xff] }
 0x46b   : > { %2312 = vmatmul.msk.f32.vlgmr.msra.gmra.mxu1 %vm1112_vm6, %v1078_v52 }
 0x46c   : > { %1875 = vmatpush.msra.mxu2 %v1853_v58  ;;  %1954 = vmatpush.msra.mxu3 %v1924_v34  ;;  %v1960_v58 = vld [vmem:[%s2760_s5] sm:$0xff] }
 0x46d   : > { %1992 = vmatpush.msrb.mxu1 %v1963_v51 }
 0x46e   : > { %1876 = vmatpush.msra.mxu2 %v1852_v59  ;;  %v2414_v59 = vld [vmem:[%s685_s24] ss:$0 sm:$0xff] }
 0x46f   : > { %1993 = vmatpush.msrb.mxu1 %v1962_v57 }
 0x470   : > { %1877 = vmatpush.msra.mxu2 %v1851_v60 }
 0x471   : > { %1994 = vmatpush.msrb.mxu1 %v1961_v9 }
 0x472   : > { %1878 = vmatpush.msra.mxu2 %v1850_v61 }
 0x473   : > { %1995 = vmatpush.msrb.mxu1 %v1960_v58 }
 0x474   : > { %1879 = vmatpush.msra.mxu2 %v1849_v62 }
 0x47a   : > { %v1632_v3 = vpop.f32.mrf.mxu3 }
 0x47b   : > { %1817 = vxpose.xlu0.b32.start [1/8] (short) (narrow) %v1632_v3, 8  ;;  %v2412_v3 = vld [vmem:[%s3157_s28] ss:$0 sm:$0xff] }
 0x488   : > { %v1658_v53 = vpop.f32.mrf.mxu1 }
 0x489   : > { %1818 = vxpose.xlu0.b32.cont [2/8] (short) (narrow) %v1658_v53, 8 }
 0x48e   : > { %v1684_v54 = vpop.f32.mrf.mxu2 }
 0x491   : > { %1819 = vxpose.xlu0.b32.cont [3/8] (short) (narrow) %v1684_v54, 8 }
 0x498   : > { %v1736_v55 = vpop.f32.mrf.mxu1 }
 0x4a3   : > { %v1710_v5 = vpop.f32.mrf.mxu3 }
 0x4a4   : > { %1820 = vxpose.xlu0.b32.cont [4/8] (short) (narrow) %v1710_v5, 8  ;;  %v2413_v5 = vld [vmem:[%s3158_s4] ss:$0 sm:$0xff] }
 0x4ac   : > { %1821 = vxpose.xlu0.b32.cont [5/8] (short) (narrow) %v1736_v55, 8 }
 0x4d8   : > { %v1762_v63 = vpop.f32.mrf.mxu2 }
 0x4d9   : > { %1822 = vxpose.xlu0.b32.cont [6/8] (short) (narrow) %v1762_v63, 8  ;;  %v2415_v63 = vld [vmem:[%s693_s15] ss:$0 sm:$0xff] }
 0x4e0   : > { %v1788_v0 = vpop.f32.mrf.mxu3 }
 0x4e1   : > { %1823 = vxpose.xlu0.b32.cont [7/8] (short) (narrow) %v1788_v0, 8 }
 0x4e8   : > { %v1814_v7 = vpop.f32.mrf.mxu1 }
 0x4e9   : > { %1824 = vxpose.xlu0.b32.end [8/8] (short) (narrow) %v1814_v7, 8 }
 0x555   : > { %v1833_v8 = vpop.trf.xlu0 }
 0x556   : > { %2313 = vmatmul.msk.f32.vlgmr.msra.gmra.mxu2 %vm915_vm5, %v1833_v8 }
 0x5d9   : > { %v1881_v12 = vpop.f32.mrf.mxu2 }
 0x5da   : > { %v1882_v13 = vadd.f32 %v2411_v11, %v1881_v12 }
 0x5dc   : > { %v1884_v14 = vadd.f32 %v1882_v13, %v2785_v29 }
 0x5de   : > { %v1887_v15 = vsel %vm915_vm5, %v1884_v14, 0.0 }
 0x5df   : > { %1888 = vadd.xlane.f32.xlu1 %v1887_v15 }
 0x652   : > { %v1889_v23 = vpop.xlane.xlu1 %1888 }
 0x653   : > { %v1897_v29 = vmul.f32 %v2978_v22, %v1889_v23 }
 0x655   : > { %v1898_v24 = vsub.f32 %v1884_v14, %v1897_v29 }
 0x657   : > { %v1899_v25 = vmul.f32 %v1898_v24, %v1898_v24 }
 0x659   : > { %v1900_v26 = vsel %vm915_vm5, %v1899_v25, 0.0 }
 0x65a   : > { %1901 = vadd.xlane.f32.xlu2 %v1900_v26  ;;  %v2416_v26 = vld [vmem:[%s696_s3] ss:$0 sm:$0xff] }
 0x6cd   : > { %v1902_v38 = vpop.xlane.xlu2 %1901 }
 0x6ce   : > { %v1903_v39 = vmul.f32 %v1902_v38, %v2978_v22 }
 0x6d0   : > { %v1904_v6 = vadd.f32 1e-05, %v1903_v39 }
 0x6d2   : > { %2452 = vrsqrt.f32 %v1904_v6  ;;  %vm1911_vm9 = vweird.f32 %v1904_v6 }
 0x6d8   : > { %v2453_v44 = vpop.eup %2452 }
 0x6d9   : > { %v1906_v46 = vmul.f32 %v2453_v44, %v1904_v6  ;;  %vm1912_vm8 = vweird.f32 %v2453_v44 }
 0x6da   : > { %vm1913_vm10 = vmor %vm1911_vm9, %vm1912_vm8 }
 0x6db   : > { %v1907_v2 = vmul.f32 %v2453_v44, %v1906_v46 }
 0x6dd   : > { %v1908_v48 = vmul.f32 0.5, %v1907_v2 }
 0x6df   : > { %v1909_v50 = vsub.f32 1.5, %v1908_v48 }
 0x6e1   : > { %v1910_v52 = vmul.f32 %v2453_v44, %v1909_v50 }
 0x6e3   : > { %v1914_v53 = vsel %vm1913_vm10, %v2453_v44, %v1910_v52 }
 0x6e4   : > { %v1915_v54 = vmul.f32 %v1914_v53, %v1898_v24 }
 0x6e6   : > { %v1919_v55 = vmul.f32 %v2412_v3, %v1915_v54 }
 0x6e8   : > { %v1923_v56 = vadd.f32 %v2413_v5, %v1919_v55 }
 0x6ea   : > { %2314 = vmatmul.msk.f32.vlgmr.msra.gmra.mxu3 %vm915_vm5, %v1923_v56 }
 0x76d   : > { %v1956_v60 = vpop.f32.mrf.mxu3 }
 0x76e   : > { %v1957_v61 = vadd.f32 %v2414_v59, %v1956_v60 }
 0x770   : > { %v1959_v62 = vmax.f32 %v1957_v61, 0.0 }
 0x772   : > { %1996 = vmatmul.f32.vlgmr.msrb.gmra.mxu1 %v1959_v62 }
 0x7ef   : > { %v1997_v0 = vpop.f32.mrf.mxu1 }
 0x7f0   : > { %v1998_v7 = vadd.f32 %v2415_v63, %v1997_v0 }
 0x7f2   : > { %v2000_v8 = vadd.f32 %v1998_v7, %v1923_v56 }
 0x7f4   : > { %v2003_v11 = vsel %vm915_vm5, %v2000_v8, 0.0 }
 0x7f5   : > { %2004 = vadd.xlane.f32.xlu2 %v2003_v11 }
 0x868   : > { %v2005_v12 = vpop.xlane.xlu2 %2004 }
 0x869   : > { %v2006_v13 = vmul.f32 %v2005_v12, %v2978_v22 }
 0x86b   : > { %v2007_v14 = vsub.f32 %v2000_v8, %v2006_v13 }
 0x86d   : > { %v2008_v15 = vmul.f32 %v2007_v14, %v2007_v14 }
 0x86f   : > { %v2009_v16 = vsel %vm915_vm5, %v2008_v15, 0.0 }
 0x870   : > { %2010 = vadd.xlane.f32.xlu2 %v2009_v16 }
 0x8e3   : > { %v2011_v17 = vpop.xlane.xlu2 %2010 }
 0x8e4   : > { %v2012_v18 = vmul.f32 %v2011_v17, %v2978_v22  ;;  %v2417_v22 = vld [vmem:[%s699_s20] ss:$0 sm:$0xff] }
 0x8e6   : > { %v2013_v19 = vadd.f32 1e-05, %v2012_v18 }
 0x8e8   : > { %2454 = vrsqrt.f32 %v2013_v19  ;;  %vm2020_vm12 = vweird.f32 %v2013_v19 }
 0x8ee   : > { %v2455_v20 = vpop.eup %2454 }
 0x8ef   : > { %v2015_v21 = vmul.f32 %v2455_v20, %v2013_v19  ;;  %vm2021_vm11 = vweird.f32 %v2455_v20 }
 0x8f0   : > { %vm2022_vm13 = vmor %vm2020_vm12, %vm2021_vm11 }
 0x8f1   : > { %v2016_v23 = vmul.f32 %v2455_v20, %v2015_v21 }
 0x8f3   : > { %v2017_v29 = vmul.f32 0.5, %v2016_v23 }
 0x8f5   : > { %v2018_v24 = vsub.f32 1.5, %v2017_v29 }
 0x8f7   : > { %v2019_v25 = vmul.f32 %v2455_v20, %v2018_v24 }
 0x8f9   : > { %v2023_v28 = vsel %vm2022_vm13, %v2455_v20, %v2019_v25 }
 0x8fa   : > { %v2024_v30 = vmul.f32 %v2023_v28, %v2007_v14 }
 0x8fc   : > { %v2028_v4 = vmul.f32 %v2416_v26, %v2024_v30  ;;  %2037 = sbr.rel (%p2315_p1) target bundleno = 2306 (0x902), region = 88 }
 0x8fe   : > { %v2032_v27 = vadd.f32 %v2417_v22, %v2028_v4 }
 0x900   : > { %2033 = vst.msk [vmem:[#allocation2] sm:$0xff] %vm915_vm5, %v2032_v27 }
 0x901   : > { %2038 = vst.msk [vmem:[%s649_s1] sm:$0xff] %vm915_vm5, %v2032_v27 }
 0x902 PF: > { %s3160_s3 = sld [smem:[#allocation10_spill]]  ;;  %s2052_s28 = sshll.u32 %s649_s1, 4  ;;  %s2053_s28 = int_to_ptr.vmem [resolvable:$true] %s2052_s28 }
 0x903   : > { %s3161_s16 = sld [smem:[#allocation7_spill]] }
 0x904   : > { %s3163_s6 = sld [smem:[#allocation26_spill]] }
 0x908   : > { %s2317_s25 = sshll.u32 %s3160_s3, 3 }
 0x909   : > { %s3164_s2 = sand.u32 1, %s3161_s16  }
 0x90a   : > { %s2050_s17 = scalar_lea.hbm %s3163_s6, %s2317_s25  ;;  %s2040_s4 = scalar_lea.sflag [#allocation4], %s3164_s2 }
 0x90b   : > { %s2054_s30 = sshll.u32 %s2050_s17, 4  ;;  %s2476_s5 = scalar_lea.hbm %s3163_s6, 16  ;;  %s2055_s30 = int_to_ptr.hbm [resolvable:$true] %s2054_s30 }
 0x90c   : > { %s2470_s27 = sshra.s32 %s2055_s30, 4  ;;  %s2471_s27 = int_to_ptr.hbm [resolvable:$true] %s2470_s27 }
 0x90d   : > { %s2472_s19 = scalar_lea.hbm %s2471_s27, 8  ;;  %p2477_p6 = scmp.lt.s32.totalorder %s2471_s27, %s3163_s6 }
 0x90e   : > { %p2473_p2 = scmp.ne.s32.totalorder %s2471_s27, %s2472_s19  ;;  %p2478_p7 = scmp.lt.s32.totalorder %s2476_s5, %s2472_s19 }
 0x910   : > { %p2474_p4 = pnand %p2473_p2, %p2684_p3  ;;  %p2479_p8 = por %p2478_p7, %p2477_p6 }
 0x912   : > { %p2475_p5 = pneg %p2474_p4 }
 0x914   : > { %p2480_p10 = pnand %p2479_p8, %p2475_p5 }
 0x916   : > { %2483 = shalt.err (!%p2480_p10)
}
 0x917   : > { %2327 = dma.vmem_to_hbm [thread:$0]  (%p2684_p3), %s2053_s28, 128, %s2055_s30, %s2040_s4  }
 0x918 PF: > { %s3165_s23 = sld [smem:[#allocation13_spill]] }
 0x919   : > { %s3166_s1 = sld [smem:[#allocation6_spill]] }
 0x91e   : > { %p2333_p11 = scmp.ge.s32.totalorder %s3165_s23, 2 }
 0x91f   : > { %s2066_s22 = sand.u32 1, %s3166_s1  }
 0x920   : > { %p2330_p12 = pnand %p2333_p11, %p2694_p9  ;;  %s2067_s3 = scalar_lea.sflag [#allocation4], %s2066_s22 }
 0x922   : > { %p2331_p13 = pneg %p2330_p12 }
 0x924   : > { %2517 = dma.done.wait (%p2331_p13), %s2067_s3, 128  }
 0x925   : > { %2519 = vsyncadd (%p2331_p13), %s2067_s3, 4294967168  ;;  %s28_s25 = sadd.s32 1, %s3165_s23   ;;  %s3168_s18 = sld [smem:[#allocation7_spill]] }
 0x926   : > { %p25_p0 = scmp.ge.s32.totalorder %s28_s25, 6   ;;  %s3169_s19 = sld [smem:[#allocation8_spill]] }
 0x927   : > { %s3170_s20 = sld [smem:[#allocation18_spill]] }
 0x928   : > { %s3171_s21 = sld [smem:[#allocation11_spill]]  ;;  %27 = sbr.rel (!%p25_p0) target bundleno = 14 (0xe), region = 159 }
 0x929   : > { %s3172_s22 = sld [smem:[#allocation12_spill]] }
 0x92a   : > { %s3173_s23 = sld [smem:[#allocation14_spill]] }
 0x92b   : > { %s3174_s24 = sld [smem:[#allocation16_spill]] }
 0x92d   :  { %2073 = vsyncpa [#allocation4], 1 }
 0x92e   :  { %2075 = vsyncpa [#allocation4 + $0x1], 1 }

</bundles_post_ra>
